<compile_context>
chip_gen: v7x
topology: tpu7x:2x2x1
jax: 0.10.0
libtpu: 0.0.40
codegen_flags: <defaults>
</compile_context>

<pallas_src>
import functools
import math

import jax
import jax.numpy as jnp
from jax import lax
from jax.experimental import pallas as pl
from jax.experimental.pallas import tpu as pltpu


# ------------------------------ fused Pallas kernel ------------------------------

def _make_mv_gru_kernel(S, B, H, num_layers, out_dim):
    """Builds the fused kernel for static (S, B, H, num_layers, out_dim).

    Merged-direction layout (built by the wrapper):
      state h            : (B, 2H)   lanes [h_fwd | h_bwd]
      gate columns (6H)  : [r_f, r_b, z_f, z_b, n_f, n_b]
      W_hh merged        : (2H, 6H)  block-diagonal per direction
      W_ih merged        : (2*Din, 6H) block-diagonal per direction
      gi slab row block s: fwd gates from time s, bwd gates from time S-1-s
    """
    H2, H4 = 2 * H, 4 * H

    def cell(gi, h, whh_m, bhn_b):
        # Single recurrent matmul for BOTH directions.
        gh = jnp.dot(h, whh_m, preferred_element_type=jnp.float32)        # (B, 6H)
        # One sigmoid for r_f, r_b, z_f, z_b (contiguous 4H columns).
        rz = jax.nn.sigmoid(gi[:, :H4] + gh[:, :H4])                       # (B, 4H)
        r = rz[:, :H2]                                                     # [r_f | r_b]
        z = rz[:, H2:]                                                     # [z_f | z_b]
        # bhn_b = [bhh_n_f | bhh_n_b] pre-broadcast once (hoisted), stays inside r*(.).
        n = jnp.tanh(gi[:, H4:] + r * (gh[:, H4:] + bhn_b))                # (B, 2H)
        return (1.0 - z) * n + z * h                                       # (B, 2H)

    def kernel(*refs):
        x_ref = refs[0]                               # (S*B, 2D) staggered [x_t | x_{S-1-t}]
        lw_ref = refs[1 + 4 * num_layers]             # (S*2H, out_dim) re-packed per merged step
        lb_ref = refs[2 + 4 * num_layers]             # (1, out_dim)
        out_ref = refs[3 + 4 * num_layers]            # (B, out_dim)

        prev_states = None
        o_acc = None

        for layer in range(num_layers):
            wih_ref, b_ref, whh_ref, bhn_ref = refs[1 + 4 * layer: 5 + 4 * layer]

            # ---- hoisted input projection: ONE slab matmul per layer (off the h-chain) ----
            if layer == 0:
                src = x_ref[...]                                           # (S*B, 2D)
            else:
                # Build the staggered slab U[t] = [y_t | y_{S-1-t}] from the previous
                # layer's merged states: states[t] = [h_f[t] | h_b[S-1-t]].
                u_blocks = []
                for t in range(S):
                    a = prev_states[t]
                    b = prev_states[S - 1 - t]
                    u_blocks.append(jnp.concatenate(
                        [a[:, :H], b[:, H:], b[:, :H], a[:, H:]], axis=-1))  # (B, 4H)
                src = jnp.concatenate(u_blocks, axis=0)                    # (S*B, 4H)

            gi_slab = jnp.dot(src, wih_ref[...],
                              preferred_element_type=jnp.float32) + b_ref[...]   # (S*B, 6H)

            whh_m = whh_ref[...]                                           # (2H, 6H)
            bhn_b = jnp.broadcast_to(bhn_ref[...], (B, H2))                # hoisted once

            last = (layer == num_layers - 1)
            if last:
                o_acc = jnp.broadcast_to(lb_ref[...], (B, out_dim))        # start from bias

            h = jnp.zeros((B, H2), jnp.float32)
            states = []
            # Fully unrolled time loop (S small & static); both directions advance together.
            for s in range(S):
                gi = gi_slab[s * B:(s + 1) * B, :]
                h = cell(gi, h, whh_m, bhn_b)
                if last:
                    # Incremental ReLU + Linear: lw_ref block s already pairs the fwd rows
                    # of time s with the bwd rows of time S-1-s (wrapper re-pack), so the
                    # merged state multiplies the right weight rows directly.
                    lw_s = lw_ref[s * H2:(s + 1) * H2, :]                  # (2H, out_dim)
                    o_acc = o_acc + jnp.dot(jnp.maximum(h, 0.0), lw_s,
                                            preferred_element_type=jnp.float32)
                else:
                    states.append(h)
            prev_states = states

        out_ref[...] = o_acc.astype(out_ref.dtype)

    return kernel


# ------------------------------- param repacking ---------------------------------

def _prep_fused_params(params, num_layers, H, S):
    """Pack per-gate/per-direction weights into merged block-diagonal matrices.

    Gate-column order: [r_f, r_b, z_f, z_b, n_f, n_b].
    Per layer returns: (wih_m (2*Din,6H), b_m (1,6H), whh_m (2H,6H), bhn_m (1,2H)).
    Also re-packs the linear weight so block s pairs (time s, fwd) rows with
    (time S-1-s, bwd) rows, matching the merged recurrence's per-step state layout.
    """
    def merge_w(wf, wb):  # wf, wb: (3, Din, H)
        zf = jnp.zeros((wf.shape[1], H), jnp.float32)
        zb = jnp.zeros((wb.shape[1], H), jnp.float32)
        top = jnp.concatenate([wf[0], zf, wf[1], zf, wf[2], zf], axis=1)   # fwd-input rows
        bot = jnp.concatenate([zb, wb[0], zb, wb[1], zb, wb[2]], axis=1)   # bwd-input rows
        return jnp.concatenate([top, bot], axis=0)

    layers = []
    for layer in range(num_layers):
        pf = params["gru"][layer]["fwd"]
        pb = params["gru"][layer]["bwd"]
        wih_m = merge_w(pf["wih"], pb["wih"])
        whh_m = merge_w(pf["whh"], pb["whh"])
        # Folded biases: (bih_r+bhh_r, bih_z+bhh_z) per direction; bih_n only (bhh_n stays
        # inside the r*(.) term).
        b_m = jnp.concatenate(
            [pf["bih"][0] + pf["bhh"][0], pb["bih"][0] + pb["bhh"][0],
             pf["bih"][1] + pf["bhh"][1], pb["bih"][1] + pb["bhh"][1],
             pf["bih"][2],                pb["bih"][2]], axis=1)           # (1, 6H)
        bhn_m = jnp.concatenate([pf["bhh"][2], pb["bhh"][2]], axis=1)      # (1, 2H)
        layers.append((wih_m, b_m, whh_m, bhn_m))

    # Linear weight re-pack for incremental accumulation by merged step.
    lw = params["lin_w_t"]                                                 # (S*2H, out_dim)
    H2 = 2 * H
    blocks = []
    for s in range(S):
        f_rows = lw[s * H2: s * H2 + H]                                    # (time s, fwd)
        b_rows = lw[(S - 1 - s) * H2 + H: (S - 1 - s) * H2 + H2]           # (time S-1-s, bwd)
        blocks.append(jnp.concatenate([f_rows, b_rows], axis=0))
    lw_rep = jnp.concatenate(blocks, axis=0)                               # (S*2H, out_dim)
    return layers, lw_rep, params["lin_b"]


# --------------------------------- call wrapper -----------------------------------

def mv_gru_forward(x, params, *, hidden_size, seq_len, horizon, input_size, num_layers):
    """x: (batch, seq_len, input_size) -> (batch, horizon, input_size)."""
    B, S, D = x.shape
    H = hidden_size
    out_dim = horizon * input_size

    # Tiny layout-only transform: staggered time-major slab [x_t | x_{S-1-t}] (S*B, 2D).
    x_tm = jnp.transpose(x.astype(jnp.float32), (1, 0, 2))                 # (S, B, D)
    x_stag = jnp.concatenate([x_tm, x_tm[::-1]], axis=-1).reshape(S * B, 2 * D)

    layer_params, lw_rep, lb = _prep_fused_params(params, num_layers, H, S)
    inputs = [x_stag]
    for lp in layer_params:
        inputs.extend(lp)
    inputs += [lw_rep, lb]

    vmem = pl.BlockSpec(memory_space=pltpu.MemorySpace.VMEM)
    out = pl.pallas_call(
        _make_mv_gru_kernel(S, B, H, num_layers, out_dim),
        out_shape=jax.ShapeDtypeStruct((B, out_dim), jnp.float32),
        in_specs=[vmem] * len(inputs),
        out_specs=vmem,
    )(*inputs)
    return out.reshape(B, horizon, input_size)


# --------------------------- pure-JAX reference check ------------------------------

def _gru_dir_ref(x_tm, wih, whh, bih, bhh):
    B = x_tm.shape[1]
    H = whh.shape[-1]

    def step(h, x_t):
        i_r = x_t @ wih[0] + bih[0]
        i_z = x_t @ wih[1] + bih[1]
        i_n = x_t @ wih[2] + bih[2]
        h_r = h @ whh[0] + bhh[0]
        h_z = h @ whh[1] + bhh[1]
        h_n = h @ whh[2] + bhh[2]
        r = jax.nn.sigmoid(i_r + h_r)
        z = jax.nn.sigmoid(i_z + h_z)
        n = jnp.tanh(i_n + r * h_n)
        h_new = (1.0 - z) * n + z * h
        return h_new, h_new

    h0 = jnp.zeros((B, H), jnp.float32)
    _, ys = lax.scan(step, h0, x_tm)
    return ys


def mv_gru_ref(x, params, *, hidden_size, seq_len, horizon, input_size, num_layers):
    B = x.shape[0]
    layer_in = jnp.transpose(x, (1, 0, 2)).astype(jnp.float32)
    for layer in range(num_layers):
        pf = params["gru"][layer]["fwd"]
        pb = params["gru"][layer]["bwd"]
        out_f = _gru_dir_ref(layer_in, pf["wih"], pf["whh"], pf["bih"], pf["bhh"])
        out_b = jnp.flip(
            _gru_dir_ref(jnp.flip(layer_in, axis=0),
                         pb["wih"], pb["whh"], pb["bih"], pb["bhh"]),
            axis=0)
        layer_in = jnp.concatenate([out_f, out_b], axis=-1)
    gru_out = jnp.transpose(layer_in, (1, 0, 2))
    flat = jnp.maximum(gru_out.reshape(B, seq_len * 2 * hidden_size), 0.0)
    lin = flat @ params["lin_w_t"] + params["lin_b"]
    return lin.reshape(B, horizon, input_size)


# ----------------------------------- init & main -----------------------------------

def init_params(key, *, input_size, hidden_size, seq_len, horizon, num_layers):
    scale = 1.0 / math.sqrt(hidden_size)
    params = {"gru": []}
    for layer in range(num_layers):
        d_in = input_size if layer == 0 else 2 * hidden_size
        layer_p = {}
        for direction in ("fwd", "bwd"):
            key, k1, k2, k3, k4 = jax.random.split(key, 5)
            layer_p[direction] = dict(
                wih=jax.random.uniform(k1, (3, d_in, hidden_size), jnp.float32, -scale, scale),
                whh=jax.random.uniform(k2, (3, hidden_size, hidden_size), jnp.float32, -scale, scale),
                bih=jax.random.uniform(k3, (3, 1, hidden_size), jnp.float32, -scale, scale),
                bhh=jax.random.uniform(k4, (3, 1, hidden_size), jnp.float32, -scale, scale),
            )
        params["gru"].append(layer_p)
    fan_in = hidden_size * seq_len * 2
    out_dim = input_size * horizon
    lscale = 1.0 / math.sqrt(fan_in)
    key, kw, kb = jax.random.split(key, 3)
    params["lin_w_t"] = jax.random.uniform(kw, (fan_in, out_dim), jnp.float32, -lscale, lscale)
    params["lin_b"] = jax.random.uniform(kb, (1, out_dim), jnp.float32, -lscale, lscale)
    return params


if __name__ == "__main__":
    input_size, hidden_size, seq_len, horizon, batch_size = 4, 32, 8, 3, 2
    num_layers = 2

    key = jax.random.PRNGKey(0)
    key, pkey, xkey = jax.random.split(key, 3)
    params = init_params(pkey, input_size=input_size, hidden_size=hidden_size,
                         seq_len=seq_len, horizon=horizon, num_layers=num_layers)
    x = jax.random.normal(xkey, (batch_size, seq_len, input_size), jnp.float32)

    fwd = jax.jit(functools.partial(
        mv_gru_forward, hidden_size=hidden_size, seq_len=seq_len,
        horizon=horizon, input_size=input_size, num_layers=num_layers))

    out = jax.block_until_ready(fwd(x, params))
    assert out.shape == (batch_size, horizon, input_size), out.shape

    ref = mv_gru_ref(x, params, hidden_size=hidden_size, seq_len=seq_len,
                     horizon=horizon, input_size=input_size, num_layers=num_layers)
    assert jnp.allclose(out, ref, rtol=1e-3, atol=1e-3), \
        f"max abs diff = {jnp.max(jnp.abs(out - ref))}"

    print("KERNEL_OK")
</pallas_src>

<mosaic_0001>
module attributes {stable_mosaic.version = 11 : i64} {
  func.func @kernel(%arg0: memref<16x8xf32, #tpu.memory_space<vmem>>, %arg1: memref<8x192xf32, #tpu.memory_space<vmem>>, %arg2: memref<1x192xf32, #tpu.memory_space<vmem>>, %arg3: memref<64x192xf32, #tpu.memory_space<vmem>>, %arg4: memref<1x64xf32, #tpu.memory_space<vmem>>, %arg5: memref<128x192xf32, #tpu.memory_space<vmem>>, %arg6: memref<1x192xf32, #tpu.memory_space<vmem>>, %arg7: memref<64x192xf32, #tpu.memory_space<vmem>>, %arg8: memref<1x64xf32, #tpu.memory_space<vmem>>, %arg9: memref<512x12xf32, #tpu.memory_space<vmem>>, %arg10: memref<1x12xf32, #tpu.memory_space<vmem>>, %arg11: memref<2x12xf32, #tpu.memory_space<vmem>>) attributes {dimension_semantics = [], scalar_prefetch = 0 : i64, scratch_operands = 0 : i64, tpu.core_type = #tpu.core_type<tc>} {
    %c0 = arith.constant 0 : index
    %c0_0 = arith.constant 0 : index
    %0 = vector.load %arg0[%c0, %c0_0] : memref<16x8xf32, #tpu.memory_space<vmem>>, vector<16x8xf32>
    %c0_1 = arith.constant 0 : index
    %c0_2 = arith.constant 0 : index
    %1 = vector.load %arg1[%c0_1, %c0_2] : memref<8x192xf32, #tpu.memory_space<vmem>>, vector<8x192xf32>
    %cst = arith.constant dense<0.000000e+00> : vector<16x192xf32>
    %2 = tpu.matmul %0, %1, %cst {dimension_numbers = #tpu.dot_dimension_numbers<[1], [0], [0], [1], [0, 0, 1, 1], [], []>} : vector<16x8xf32>, vector<8x192xf32>, vector<16x192xf32> -> vector<16x192xf32>
    %c0_3 = arith.constant 0 : index
    %c0_4 = arith.constant 0 : index
    %3 = vector.load %arg2[%c0_3, %c0_4] : memref<1x192xf32, #tpu.memory_space<vmem>>, vector<1x192xf32>
    %4 = vector.broadcast %3 : vector<1x192xf32> to vector<16x192xf32>
    %5 = arith.addf %2, %4 : vector<16x192xf32>
    %c0_5 = arith.constant 0 : index
    %c0_6 = arith.constant 0 : index
    %6 = vector.load %arg3[%c0_5, %c0_6] : memref<64x192xf32, #tpu.memory_space<vmem>>, vector<64x192xf32>
    %c0_7 = arith.constant 0 : index
    %c0_8 = arith.constant 0 : index
    %7 = vector.load %arg4[%c0_7, %c0_8] : memref<1x64xf32, #tpu.memory_space<vmem>>, vector<1x64xf32>
    %8 = vector.shape_cast %7 : vector<1x64xf32> to vector<1x64xf32>
    %9 = vector.broadcast %8 : vector<1x64xf32> to vector<2x64xf32>
    %cst_9 = arith.constant 0.000000e+00 : f32
    %10 = vector.broadcast %cst_9 : f32 to vector<2x64xf32>
    %11 = vector.extract_strided_slice %5 {offsets = [0, 0], sizes = [2, 192], strides = [1, 1]} : vector<16x192xf32> to vector<2x192xf32>
    %cst_10 = arith.constant dense<0.000000e+00> : vector<2x192xf32>
    %12 = tpu.matmul %10, %6, %cst_10 {dimension_numbers = #tpu.dot_dimension_numbers<[1], [0], [0], [1], [0, 0, 1, 1], [], []>} : vector<2x64xf32>, vector<64x192xf32>, vector<2x192xf32> -> vector<2x192xf32>
    %13 = vector.extract_strided_slice %11 {offsets = [0, 0], sizes = [2, 128], strides = [1, 1]} : vector<2x192xf32> to vector<2x128xf32>
    %14 = vector.extract_strided_slice %12 {offsets = [0, 0], sizes = [2, 128], strides = [1, 1]} : vector<2x192xf32> to vector<2x128xf32>
    %15 = arith.addf %13, %14 : vector<2x128xf32>
    %16 = arith.negf %15 : vector<2x128xf32>
    %17 = math.exp %16 : vector<2x128xf32>
    %cst_11 = arith.constant 1.000000e+00 : f32
    %18 = vector.broadcast %cst_11 : f32 to vector<2x128xf32>
    %19 = arith.addf %18, %17 : vector<2x128xf32>
    %20 = arith.divf %18, %19 : vector<2x128xf32>
    %21 = vector.extract_strided_slice %20 {offsets = [0, 0], sizes = [2, 64], strides = [1, 1]} : vector<2x128xf32> to vector<2x64xf32>
    %22 = vector.extract_strided_slice %20 {offsets = [0, 64], sizes = [2, 64], strides = [1, 1]} : vector<2x128xf32> to vector<2x64xf32>
    %23 = vector.extract_strided_slice %11 {offsets = [0, 128], sizes = [2, 64], strides = [1, 1]} : vector<2x192xf32> to vector<2x64xf32>
    %24 = vector.extract_strided_slice %12 {offsets = [0, 128], sizes = [2, 64], strides = [1, 1]} : vector<2x192xf32> to vector<2x64xf32>
    %25 = arith.addf %24, %9 : vector<2x64xf32>
    %26 = arith.mulf %21, %25 : vector<2x64xf32>
    %27 = arith.addf %23, %26 : vector<2x64xf32>
    %28 = math.tanh %27 : vector<2x64xf32>
    %cst_12 = arith.constant 1.000000e+00 : f32
    %29 = vector.broadcast %cst_12 : f32 to vector<2x64xf32>
    %30 = arith.subf %29, %22 : vector<2x64xf32>
    %31 = arith.mulf %30, %28 : vector<2x64xf32>
    %32 = arith.mulf %22, %10 : vector<2x64xf32>
    %33 = arith.addf %31, %32 : vector<2x64xf32>
    %34 = vector.extract_strided_slice %5 {offsets = [2, 0], sizes = [2, 192], strides = [1, 1]} : vector<16x192xf32> to vector<2x192xf32>
    %cst_13 = arith.constant dense<0.000000e+00> : vector<2x192xf32>
    %35 = tpu.matmul %33, %6, %cst_13 {dimension_numbers = #tpu.dot_dimension_numbers<[1], [0], [0], [1], [0, 0, 1, 1], [], []>} : vector<2x64xf32>, vector<64x192xf32>, vector<2x192xf32> -> vector<2x192xf32>
    %36 = vector.extract_strided_slice %34 {offsets = [0, 0], sizes = [2, 128], strides = [1, 1]} : vector<2x192xf32> to vector<2x128xf32>
    %37 = vector.extract_strided_slice %35 {offsets = [0, 0], sizes = [2, 128], strides = [1, 1]} : vector<2x192xf32> to vector<2x128xf32>
    %38 = arith.addf %36, %37 : vector<2x128xf32>
    %39 = arith.negf %38 : vector<2x128xf32>
    %40 = math.exp %39 : vector<2x128xf32>
    %cst_14 = arith.constant 1.000000e+00 : f32
    %41 = vector.broadcast %cst_14 : f32 to vector<2x128xf32>
    %42 = arith.addf %41, %40 : vector<2x128xf32>
    %43 = arith.divf %41, %42 : vector<2x128xf32>
    %44 = vector.extract_strided_slice %43 {offsets = [0, 0], sizes = [2, 64], strides = [1, 1]} : vector<2x128xf32> to vector<2x64xf32>
    %45 = vector.extract_strided_slice %43 {offsets = [0, 64], sizes = [2, 64], strides = [1, 1]} : vector<2x128xf32> to vector<2x64xf32>
    %46 = vector.extract_strided_slice %34 {offsets = [0, 128], sizes = [2, 64], strides = [1, 1]} : vector<2x192xf32> to vector<2x64xf32>
    %47 = vector.extract_strided_slice %35 {offsets = [0, 128], sizes = [2, 64], strides = [1, 1]} : vector<2x192xf32> to vector<2x64xf32>
    %48 = arith.addf %47, %9 : vector<2x64xf32>
    %49 = arith.mulf %44, %48 : vector<2x64xf32>
    %50 = arith.addf %46, %49 : vector<2x64xf32>
    %51 = math.tanh %50 : vector<2x64xf32>
    %cst_15 = arith.constant 1.000000e+00 : f32
    %52 = vector.broadcast %cst_15 : f32 to vector<2x64xf32>
    %53 = arith.subf %52, %45 : vector<2x64xf32>
    %54 = arith.mulf %53, %51 : vector<2x64xf32>
    %55 = arith.mulf %45, %33 : vector<2x64xf32>
    %56 = arith.addf %54, %55 : vector<2x64xf32>
    %57 = vector.extract_strided_slice %5 {offsets = [4, 0], sizes = [2, 192], strides = [1, 1]} : vector<16x192xf32> to vector<2x192xf32>
    %cst_16 = arith.constant dense<0.000000e+00> : vector<2x192xf32>
    %58 = tpu.matmul %56, %6, %cst_16 {dimension_numbers = #tpu.dot_dimension_numbers<[1], [0], [0], [1], [0, 0, 1, 1], [], []>} : vector<2x64xf32>, vector<64x192xf32>, vector<2x192xf32> -> vector<2x192xf32>
    %59 = vector.extract_strided_slice %57 {offsets = [0, 0], sizes = [2, 128], strides = [1, 1]} : vector<2x192xf32> to vector<2x128xf32>
    %60 = vector.extract_strided_slice %58 {offsets = [0, 0], sizes = [2, 128], strides = [1, 1]} : vector<2x192xf32> to vector<2x128xf32>
    %61 = arith.addf %59, %60 : vector<2x128xf32>
    %62 = arith.negf %61 : vector<2x128xf32>
    %63 = math.exp %62 : vector<2x128xf32>
    %cst_17 = arith.constant 1.000000e+00 : f32
    %64 = vector.broadcast %cst_17 : f32 to vector<2x128xf32>
    %65 = arith.addf %64, %63 : vector<2x128xf32>
    %66 = arith.divf %64, %65 : vector<2x128xf32>
    %67 = vector.extract_strided_slice %66 {offsets = [0, 0], sizes = [2, 64], strides = [1, 1]} : vector<2x128xf32> to vector<2x64xf32>
    %68 = vector.extract_strided_slice %66 {offsets = [0, 64], sizes = [2, 64], strides = [1, 1]} : vector<2x128xf32> to vector<2x64xf32>
    %69 = vector.extract_strided_slice %57 {offsets = [0, 128], sizes = [2, 64], strides = [1, 1]} : vector<2x192xf32> to vector<2x64xf32>
    %70 = vector.extract_strided_slice %58 {offsets = [0, 128], sizes = [2, 64], strides = [1, 1]} : vector<2x192xf32> to vector<2x64xf32>
    %71 = arith.addf %70, %9 : vector<2x64xf32>
    %72 = arith.mulf %67, %71 : vector<2x64xf32>
    %73 = arith.addf %69, %72 : vector<2x64xf32>
    %74 = math.tanh %73 : vector<2x64xf32>
    %cst_18 = arith.constant 1.000000e+00 : f32
    %75 = vector.broadcast %cst_18 : f32 to vector<2x64xf32>
    %76 = arith.subf %75, %68 : vector<2x64xf32>
    %77 = arith.mulf %76, %74 : vector<2x64xf32>
    %78 = arith.mulf %68, %56 : vector<2x64xf32>
    %79 = arith.addf %77, %78 : vector<2x64xf32>
    %80 = vector.extract_strided_slice %5 {offsets = [6, 0], sizes = [2, 192], strides = [1, 1]} : vector<16x192xf32> to vector<2x192xf32>
    %cst_19 = arith.constant dense<0.000000e+00> : vector<2x192xf32>
    %81 = tpu.matmul %79, %6, %cst_19 {dimension_numbers = #tpu.dot_dimension_numbers<[1], [0], [0], [1], [0, 0, 1, 1], [], []>} : vector<2x64xf32>, vector<64x192xf32>, vector<2x192xf32> -> vector<2x192xf32>
    %82 = vector.extract_strided_slice %80 {offsets = [0, 0], sizes = [2, 128], strides = [1, 1]} : vector<2x192xf32> to vector<2x128xf32>
    %83 = vector.extract_strided_slice %81 {offsets = [0, 0], sizes = [2, 128], strides = [1, 1]} : vector<2x192xf32> to vector<2x128xf32>
    %84 = arith.addf %82, %83 : vector<2x128xf32>
    %85 = arith.negf %84 : vector<2x128xf32>
    %86 = math.exp %85 : vector<2x128xf32>
    %cst_20 = arith.constant 1.000000e+00 : f32
    %87 = vector.broadcast %cst_20 : f32 to vector<2x128xf32>
    %88 = arith.addf %87, %86 : vector<2x128xf32>
    %89 = arith.divf %87, %88 : vector<2x128xf32>
    %90 = vector.extract_strided_slice %89 {offsets = [0, 0], sizes = [2, 64], strides = [1, 1]} : vector<2x128xf32> to vector<2x64xf32>
    %91 = vector.extract_strided_slice %89 {offsets = [0, 64], sizes = [2, 64], strides = [1, 1]} : vector<2x128xf32> to vector<2x64xf32>
    %92 = vector.extract_strided_slice %80 {offsets = [0, 128], sizes = [2, 64], strides = [1, 1]} : vector<2x192xf32> to vector<2x64xf32>
    %93 = vector.extract_strided_slice %81 {offsets = [0, 128], sizes = [2, 64], strides = [1, 1]} : vector<2x192xf32> to vector<2x64xf32>
    %94 = arith.addf %93, %9 : vector<2x64xf32>
    %95 = arith.mulf %90, %94 : vector<2x64xf32>
    %96 = arith.addf %92, %95 : vector<2x64xf32>
    %97 = math.tanh %96 : vector<2x64xf32>
    %cst_21 = arith.constant 1.000000e+00 : f32
    %98 = vector.broadcast %cst_21 : f32 to vector<2x64xf32>
    %99 = arith.subf %98, %91 : vector<2x64xf32>
    %100 = arith.mulf %99, %97 : vector<2x64xf32>
    %101 = arith.mulf %91, %79 : vector<2x64xf32>
    %102 = arith.addf %100, %101 : vector<2x64xf32>
    %103 = vector.extract_strided_slice %5 {offsets = [8, 0], sizes = [2, 192], strides = [1, 1]} : vector<16x192xf32> to vector<2x192xf32>
    %cst_22 = arith.constant dense<0.000000e+00> : vector<2x192xf32>
    %104 = tpu.matmul %102, %6, %cst_22 {dimension_numbers = #tpu.dot_dimension_numbers<[1], [0], [0], [1], [0, 0, 1, 1], [], []>} : vector<2x64xf32>, vector<64x192xf32>, vector<2x192xf32> -> vector<2x192xf32>
    %105 = vector.extract_strided_slice %103 {offsets = [0, 0], sizes = [2, 128], strides = [1, 1]} : vector<2x192xf32> to vector<2x128xf32>
    %106 = vector.extract_strided_slice %104 {offsets = [0, 0], sizes = [2, 128], strides = [1, 1]} : vector<2x192xf32> to vector<2x128xf32>
    %107 = arith.addf %105, %106 : vector<2x128xf32>
    %108 = arith.negf %107 : vector<2x128xf32>
    %109 = math.exp %108 : vector<2x128xf32>
    %cst_23 = arith.constant 1.000000e+00 : f32
    %110 = vector.broadcast %cst_23 : f32 to vector<2x128xf32>
    %111 = arith.addf %110, %109 : vector<2x128xf32>
    %112 = arith.divf %110, %111 : vector<2x128xf32>
    %113 = vector.extract_strided_slice %112 {offsets = [0, 0], sizes = [2, 64], strides = [1, 1]} : vector<2x128xf32> to vector<2x64xf32>
    %114 = vector.extract_strided_slice %112 {offsets = [0, 64], sizes = [2, 64], strides = [1, 1]} : vector<2x128xf32> to vector<2x64xf32>
    %115 = vector.extract_strided_slice %103 {offsets = [0, 128], sizes = [2, 64], strides = [1, 1]} : vector<2x192xf32> to vector<2x64xf32>
    %116 = vector.extract_strided_slice %104 {offsets = [0, 128], sizes = [2, 64], strides = [1, 1]} : vector<2x192xf32> to vector<2x64xf32>
    %117 = arith.addf %116, %9 : vector<2x64xf32>
    %118 = arith.mulf %113, %117 : vector<2x64xf32>
    %119 = arith.addf %115, %118 : vector<2x64xf32>
    %120 = math.tanh %119 : vector<2x64xf32>
    %cst_24 = arith.constant 1.000000e+00 : f32
    %121 = vector.broadcast %cst_24 : f32 to vector<2x64xf32>
    %122 = arith.subf %121, %114 : vector<2x64xf32>
    %123 = arith.mulf %122, %120 : vector<2x64xf32>
    %124 = arith.mulf %114, %102 : vector<2x64xf32>
    %125 = arith.addf %123, %124 : vector<2x64xf32>
    %126 = vector.extract_strided_slice %5 {offsets = [10, 0], sizes = [2, 192], strides = [1, 1]} : vector<16x192xf32> to vector<2x192xf32>
    %cst_25 = arith.constant dense<0.000000e+00> : vector<2x192xf32>
    %127 = tpu.matmul %125, %6, %cst_25 {dimension_numbers = #tpu.dot_dimension_numbers<[1], [0], [0], [1], [0, 0, 1, 1], [], []>} : vector<2x64xf32>, vector<64x192xf32>, vector<2x192xf32> -> vector<2x192xf32>
    %128 = vector.extract_strided_slice %126 {offsets = [0, 0], sizes = [2, 128], strides = [1, 1]} : vector<2x192xf32> to vector<2x128xf32>
    %129 = vector.extract_strided_slice %127 {offsets = [0, 0], sizes = [2, 128], strides = [1, 1]} : vector<2x192xf32> to vector<2x128xf32>
    %130 = arith.addf %128, %129 : vector<2x128xf32>
    %131 = arith.negf %130 : vector<2x128xf32>
    %132 = math.exp %131 : vector<2x128xf32>
    %cst_26 = arith.constant 1.000000e+00 : f32
    %133 = vector.broadcast %cst_26 : f32 to vector<2x128xf32>
    %134 = arith.addf %133, %132 : vector<2x128xf32>
    %135 = arith.divf %133, %134 : vector<2x128xf32>
    %136 = vector.extract_strided_slice %135 {offsets = [0, 0], sizes = [2, 64], strides = [1, 1]} : vector<2x128xf32> to vector<2x64xf32>
    %137 = vector.extract_strided_slice %135 {offsets = [0, 64], sizes = [2, 64], strides = [1, 1]} : vector<2x128xf32> to vector<2x64xf32>
    %138 = vector.extract_strided_slice %126 {offsets = [0, 128], sizes = [2, 64], strides = [1, 1]} : vector<2x192xf32> to vector<2x64xf32>
    %139 = vector.extract_strided_slice %127 {offsets = [0, 128], sizes = [2, 64], strides = [1, 1]} : vector<2x192xf32> to vector<2x64xf32>
    %140 = arith.addf %139, %9 : vector<2x64xf32>
    %141 = arith.mulf %136, %140 : vector<2x64xf32>
    %142 = arith.addf %138, %141 : vector<2x64xf32>
    %143 = math.tanh %142 : vector<2x64xf32>
    %cst_27 = arith.constant 1.000000e+00 : f32
    %144 = vector.broadcast %cst_27 : f32 to vector<2x64xf32>
    %145 = arith.subf %144, %137 : vector<2x64xf32>
    %146 = arith.mulf %145, %143 : vector<2x64xf32>
    %147 = arith.mulf %137, %125 : vector<2x64xf32>
    %148 = arith.addf %146, %147 : vector<2x64xf32>
    %149 = vector.extract_strided_slice %5 {offsets = [12, 0], sizes = [2, 192], strides = [1, 1]} : vector<16x192xf32> to vector<2x192xf32>
    %cst_28 = arith.constant dense<0.000000e+00> : vector<2x192xf32>
    %150 = tpu.matmul %148, %6, %cst_28 {dimension_numbers = #tpu.dot_dimension_numbers<[1], [0], [0], [1], [0, 0, 1, 1], [], []>} : vector<2x64xf32>, vector<64x192xf32>, vector<2x192xf32> -> vector<2x192xf32>
    %151 = vector.extract_strided_slice %149 {offsets = [0, 0], sizes = [2, 128], strides = [1, 1]} : vector<2x192xf32> to vector<2x128xf32>
    %152 = vector.extract_strided_slice %150 {offsets = [0, 0], sizes = [2, 128], strides = [1, 1]} : vector<2x192xf32> to vector<2x128xf32>
    %153 = arith.addf %151, %152 : vector<2x128xf32>
    %154 = arith.negf %153 : vector<2x128xf32>
    %155 = math.exp %154 : vector<2x128xf32>
    %cst_29 = arith.constant 1.000000e+00 : f32
    %156 = vector.broadcast %cst_29 : f32 to vector<2x128xf32>
    %157 = arith.addf %156, %155 : vector<2x128xf32>
    %158 = arith.divf %156, %157 : vector<2x128xf32>
    %159 = vector.extract_strided_slice %158 {offsets = [0, 0], sizes = [2, 64], strides = [1, 1]} : vector<2x128xf32> to vector<2x64xf32>
    %160 = vector.extract_strided_slice %158 {offsets = [0, 64], sizes = [2, 64], strides = [1, 1]} : vector<2x128xf32> to vector<2x64xf32>
    %161 = vector.extract_strided_slice %149 {offsets = [0, 128], sizes = [2, 64], strides = [1, 1]} : vector<2x192xf32> to vector<2x64xf32>
    %162 = vector.extract_strided_slice %150 {offsets = [0, 128], sizes = [2, 64], strides = [1, 1]} : vector<2x192xf32> to vector<2x64xf32>
    %163 = arith.addf %162, %9 : vector<2x64xf32>
    %164 = arith.mulf %159, %163 : vector<2x64xf32>
    %165 = arith.addf %161, %164 : vector<2x64xf32>
    %166 = math.tanh %165 : vector<2x64xf32>
    %cst_30 = arith.constant 1.000000e+00 : f32
    %167 = vector.broadcast %cst_30 : f32 to vector<2x64xf32>
    %168 = arith.subf %167, %160 : vector<2x64xf32>
    %169 = arith.mulf %168, %166 : vector<2x64xf32>
    %170 = arith.mulf %160, %148 : vector<2x64xf32>
    %171 = arith.addf %169, %170 : vector<2x64xf32>
    %172 = vector.extract_strided_slice %5 {offsets = [14, 0], sizes = [2, 192], strides = [1, 1]} : vector<16x192xf32> to vector<2x192xf32>
    %cst_31 = arith.constant dense<0.000000e+00> : vector<2x192xf32>
    %173 = tpu.matmul %171, %6, %cst_31 {dimension_numbers = #tpu.dot_dimension_numbers<[1], [0], [0], [1], [0, 0, 1, 1], [], []>} : vector<2x64xf32>, vector<64x192xf32>, vector<2x192xf32> -> vector<2x192xf32>
    %174 = vector.extract_strided_slice %172 {offsets = [0, 0], sizes = [2, 128], strides = [1, 1]} : vector<2x192xf32> to vector<2x128xf32>
    %175 = vector.extract_strided_slice %173 {offsets = [0, 0], sizes = [2, 128], strides = [1, 1]} : vector<2x192xf32> to vector<2x128xf32>
    %176 = arith.addf %174, %175 : vector<2x128xf32>
    %177 = arith.negf %176 : vector<2x128xf32>
    %178 = math.exp %177 : vector<2x128xf32>
    %cst_32 = arith.constant 1.000000e+00 : f32
    %179 = vector.broadcast %cst_32 : f32 to vector<2x128xf32>
    %180 = arith.addf %179, %178 : vector<2x128xf32>
    %181 = arith.divf %179, %180 : vector<2x128xf32>
    %182 = vector.extract_strided_slice %181 {offsets = [0, 0], sizes = [2, 64], strides = [1, 1]} : vector<2x128xf32> to vector<2x64xf32>
    %183 = vector.extract_strided_slice %181 {offsets = [0, 64], sizes = [2, 64], strides = [1, 1]} : vector<2x128xf32> to vector<2x64xf32>
    %184 = vector.extract_strided_slice %172 {offsets = [0, 128], sizes = [2, 64], strides = [1, 1]} : vector<2x192xf32> to vector<2x64xf32>
    %185 = vector.extract_strided_slice %173 {offsets = [0, 128], sizes = [2, 64], strides = [1, 1]} : vector<2x192xf32> to vector<2x64xf32>
    %186 = arith.addf %185, %9 : vector<2x64xf32>
    %187 = arith.mulf %182, %186 : vector<2x64xf32>
    %188 = arith.addf %184, %187 : vector<2x64xf32>
    %189 = math.tanh %188 : vector<2x64xf32>
    %cst_33 = arith.constant 1.000000e+00 : f32
    %190 = vector.broadcast %cst_33 : f32 to vector<2x64xf32>
    %191 = arith.subf %190, %183 : vector<2x64xf32>
    %192 = arith.mulf %191, %189 : vector<2x64xf32>
    %193 = arith.mulf %183, %171 : vector<2x64xf32>
    %194 = arith.addf %192, %193 : vector<2x64xf32>
    %195 = vector.extract_strided_slice %33 {offsets = [0, 0], sizes = [2, 32], strides = [1, 1]} : vector<2x64xf32> to vector<2x32xf32>
    %196 = vector.extract_strided_slice %194 {offsets = [0, 32], sizes = [2, 32], strides = [1, 1]} : vector<2x64xf32> to vector<2x32xf32>
    %197 = vector.extract_strided_slice %194 {offsets = [0, 0], sizes = [2, 32], strides = [1, 1]} : vector<2x64xf32> to vector<2x32xf32>
    %198 = vector.extract_strided_slice %33 {offsets = [0, 32], sizes = [2, 32], strides = [1, 1]} : vector<2x64xf32> to vector<2x32xf32>
    %199 = tpu.concatenate %195, %196, %197, %198 in 1 : vector<2x32xf32>, vector<2x32xf32>, vector<2x32xf32>, vector<2x32xf32> -> vector<2x128xf32>
    %200 = vector.extract_strided_slice %56 {offsets = [0, 0], sizes = [2, 32], strides = [1, 1]} : vector<2x64xf32> to vector<2x32xf32>
    %201 = vector.extract_strided_slice %171 {offsets = [0, 32], sizes = [2, 32], strides = [1, 1]} : vector<2x64xf32> to vector<2x32xf32>
    %202 = vector.extract_strided_slice %171 {offsets = [0, 0], sizes = [2, 32], strides = [1, 1]} : vector<2x64xf32> to vector<2x32xf32>
    %203 = vector.extract_strided_slice %56 {offsets = [0, 32], sizes = [2, 32], strides = [1, 1]} : vector<2x64xf32> to vector<2x32xf32>
    %204 = tpu.concatenate %200, %201, %202, %203 in 1 : vector<2x32xf32>, vector<2x32xf32>, vector<2x32xf32>, vector<2x32xf32> -> vector<2x128xf32>
    %205 = vector.extract_strided_slice %79 {offsets = [0, 0], sizes = [2, 32], strides = [1, 1]} : vector<2x64xf32> to vector<2x32xf32>
    %206 = vector.extract_strided_slice %148 {offsets = [0, 32], sizes = [2, 32], strides = [1, 1]} : vector<2x64xf32> to vector<2x32xf32>
    %207 = vector.extract_strided_slice %148 {offsets = [0, 0], sizes = [2, 32], strides = [1, 1]} : vector<2x64xf32> to vector<2x32xf32>
    %208 = vector.extract_strided_slice %79 {offsets = [0, 32], sizes = [2, 32], strides = [1, 1]} : vector<2x64xf32> to vector<2x32xf32>
    %209 = tpu.concatenate %205, %206, %207, %208 in 1 : vector<2x32xf32>, vector<2x32xf32>, vector<2x32xf32>, vector<2x32xf32> -> vector<2x128xf32>
    %210 = vector.extract_strided_slice %102 {offsets = [0, 0], sizes = [2, 32], strides = [1, 1]} : vector<2x64xf32> to vector<2x32xf32>
    %211 = vector.extract_strided_slice %125 {offsets = [0, 32], sizes = [2, 32], strides = [1, 1]} : vector<2x64xf32> to vector<2x32xf32>
    %212 = vector.extract_strided_slice %125 {offsets = [0, 0], sizes = [2, 32], strides = [1, 1]} : vector<2x64xf32> to vector<2x32xf32>
    %213 = vector.extract_strided_slice %102 {offsets = [0, 32], sizes = [2, 32], strides = [1, 1]} : vector<2x64xf32> to vector<2x32xf32>
    %214 = tpu.concatenate %210, %211, %212, %213 in 1 : vector<2x32xf32>, vector<2x32xf32>, vector<2x32xf32>, vector<2x32xf32> -> vector<2x128xf32>
    %215 = vector.extract_strided_slice %125 {offsets = [0, 0], sizes = [2, 32], strides = [1, 1]} : vector<2x64xf32> to vector<2x32xf32>
    %216 = vector.extract_strided_slice %102 {offsets = [0, 32], sizes = [2, 32], strides = [1, 1]} : vector<2x64xf32> to vector<2x32xf32>
    %217 = vector.extract_strided_slice %102 {offsets = [0, 0], sizes = [2, 32], strides = [1, 1]} : vector<2x64xf32> to vector<2x32xf32>
    %218 = vector.extract_strided_slice %125 {offsets = [0, 32], sizes = [2, 32], strides = [1, 1]} : vector<2x64xf32> to vector<2x32xf32>
    %219 = tpu.concatenate %215, %216, %217, %218 in 1 : vector<2x32xf32>, vector<2x32xf32>, vector<2x32xf32>, vector<2x32xf32> -> vector<2x128xf32>
    %220 = vector.extract_strided_slice %148 {offsets = [0, 0], sizes = [2, 32], strides = [1, 1]} : vector<2x64xf32> to vector<2x32xf32>
    %221 = vector.extract_strided_slice %79 {offsets = [0, 32], sizes = [2, 32], strides = [1, 1]} : vector<2x64xf32> to vector<2x32xf32>
    %222 = vector.extract_strided_slice %79 {offsets = [0, 0], sizes = [2, 32], strides = [1, 1]} : vector<2x64xf32> to vector<2x32xf32>
    %223 = vector.extract_strided_slice %148 {offsets = [0, 32], sizes = [2, 32], strides = [1, 1]} : vector<2x64xf32> to vector<2x32xf32>
    %224 = tpu.concatenate %220, %221, %222, %223 in 1 : vector<2x32xf32>, vector<2x32xf32>, vector<2x32xf32>, vector<2x32xf32> -> vector<2x128xf32>
    %225 = vector.extract_strided_slice %171 {offsets = [0, 0], sizes = [2, 32], strides = [1, 1]} : vector<2x64xf32> to vector<2x32xf32>
    %226 = vector.extract_strided_slice %56 {offsets = [0, 32], sizes = [2, 32], strides = [1, 1]} : vector<2x64xf32> to vector<2x32xf32>
    %227 = vector.extract_strided_slice %56 {offsets = [0, 0], sizes = [2, 32], strides = [1, 1]} : vector<2x64xf32> to vector<2x32xf32>
    %228 = vector.extract_strided_slice %171 {offsets = [0, 32], sizes = [2, 32], strides = [1, 1]} : vector<2x64xf32> to vector<2x32xf32>
    %229 = tpu.concatenate %225, %226, %227, %228 in 1 : vector<2x32xf32>, vector<2x32xf32>, vector<2x32xf32>, vector<2x32xf32> -> vector<2x128xf32>
    %230 = vector.extract_strided_slice %194 {offsets = [0, 0], sizes = [2, 32], strides = [1, 1]} : vector<2x64xf32> to vector<2x32xf32>
    %231 = vector.extract_strided_slice %33 {offsets = [0, 32], sizes = [2, 32], strides = [1, 1]} : vector<2x64xf32> to vector<2x32xf32>
    %232 = vector.extract_strided_slice %33 {offsets = [0, 0], sizes = [2, 32], strides = [1, 1]} : vector<2x64xf32> to vector<2x32xf32>
    %233 = vector.extract_strided_slice %194 {offsets = [0, 32], sizes = [2, 32], strides = [1, 1]} : vector<2x64xf32> to vector<2x32xf32>
    %234 = tpu.concatenate %230, %231, %232, %233 in 1 : vector<2x32xf32>, vector<2x32xf32>, vector<2x32xf32>, vector<2x32xf32> -> vector<2x128xf32>
    %235 = tpu.concatenate %199, %204, %209, %214, %219, %224, %229, %234 in 0 : vector<2x128xf32>, vector<2x128xf32>, vector<2x128xf32>, vector<2x128xf32>, vector<2x128xf32>, vector<2x128xf32>, vector<2x128xf32>, vector<2x128xf32> -> vector<16x128xf32>
    %c0_34 = arith.constant 0 : index
    %c0_35 = arith.constant 0 : index
    %236 = vector.load %arg5[%c0_34, %c0_35] : memref<128x192xf32, #tpu.memory_space<vmem>>, vector<128x192xf32>
    %cst_36 = arith.constant dense<0.000000e+00> : vector<16x192xf32>
    %237 = tpu.matmul %235, %236, %cst_36 {dimension_numbers = #tpu.dot_dimension_numbers<[1], [0], [0], [1], [0, 0, 1, 1], [], []>} : vector<16x128xf32>, vector<128x192xf32>, vector<16x192xf32> -> vector<16x192xf32>
    %c0_37 = arith.constant 0 : index
    %c0_38 = arith.constant 0 : index
    %238 = vector.load %arg6[%c0_37, %c0_38] : memref<1x192xf32, #tpu.memory_space<vmem>>, vector<1x192xf32>
    %239 = vector.broadcast %238 : vector<1x192xf32> to vector<16x192xf32>
    %240 = arith.addf %237, %239 : vector<16x192xf32>
    %c0_39 = arith.constant 0 : index
    %c0_40 = arith.constant 0 : index
    %241 = vector.load %arg7[%c0_39, %c0_40] : memref<64x192xf32, #tpu.memory_space<vmem>>, vector<64x192xf32>
    %c0_41 = arith.constant 0 : index
    %c0_42 = arith.constant 0 : index
    %242 = vector.load %arg8[%c0_41, %c0_42] : memref<1x64xf32, #tpu.memory_space<vmem>>, vector<1x64xf32>
    %243 = vector.shape_cast %242 : vector<1x64xf32> to vector<1x64xf32>
    %244 = vector.broadcast %243 : vector<1x64xf32> to vector<2x64xf32>
    %c0_43 = arith.constant 0 : index
    %c0_44 = arith.constant 0 : index
    %245 = vector.load %arg10[%c0_43, %c0_44] : memref<1x12xf32, #tpu.memory_space<vmem>>, vector<1x12xf32>
    %246 = vector.shape_cast %245 : vector<1x12xf32> to vector<1x12xf32>
    %247 = vector.broadcast %246 : vector<1x12xf32> to vector<2x12xf32>
    %cst_45 = arith.constant 0.000000e+00 : f32
    %248 = vector.broadcast %cst_45 : f32 to vector<2x64xf32>
    %249 = vector.extract_strided_slice %240 {offsets = [0, 0], sizes = [2, 192], strides = [1, 1]} : vector<16x192xf32> to vector<2x192xf32>
    %cst_46 = arith.constant dense<0.000000e+00> : vector<2x192xf32>
    %250 = tpu.matmul %248, %241, %cst_46 {dimension_numbers = #tpu.dot_dimension_numbers<[1], [0], [0], [1], [0, 0, 1, 1], [], []>} : vector<2x64xf32>, vector<64x192xf32>, vector<2x192xf32> -> vector<2x192xf32>
    %251 = vector.extract_strided_slice %249 {offsets = [0, 0], sizes = [2, 128], strides = [1, 1]} : vector<2x192xf32> to vector<2x128xf32>
    %252 = vector.extract_strided_slice %250 {offsets = [0, 0], sizes = [2, 128], strides = [1, 1]} : vector<2x192xf32> to vector<2x128xf32>
    %253 = arith.addf %251, %252 : vector<2x128xf32>
    %254 = arith.negf %253 : vector<2x128xf32>
    %255 = math.exp %254 : vector<2x128xf32>
    %cst_47 = arith.constant 1.000000e+00 : f32
    %256 = vector.broadcast %cst_47 : f32 to vector<2x128xf32>
    %257 = arith.addf %256, %255 : vector<2x128xf32>
    %258 = arith.divf %256, %257 : vector<2x128xf32>
    %259 = vector.extract_strided_slice %258 {offsets = [0, 0], sizes = [2, 64], strides = [1, 1]} : vector<2x128xf32> to vector<2x64xf32>
    %260 = vector.extract_strided_slice %258 {offsets = [0, 64], sizes = [2, 64], strides = [1, 1]} : vector<2x128xf32> to vector<2x64xf32>
    %261 = vector.extract_strided_slice %249 {offsets = [0, 128], sizes = [2, 64], strides = [1, 1]} : vector<2x192xf32> to vector<2x64xf32>
    %262 = vector.extract_strided_slice %250 {offsets = [0, 128], sizes = [2, 64], strides = [1, 1]} : vector<2x192xf32> to vector<2x64xf32>
    %263 = arith.addf %262, %244 : vector<2x64xf32>
    %264 = arith.mulf %259, %263 : vector<2x64xf32>
    %265 = arith.addf %261, %264 : vector<2x64xf32>
    %266 = math.tanh %265 : vector<2x64xf32>
    %cst_48 = arith.constant 1.000000e+00 : f32
    %267 = vector.broadcast %cst_48 : f32 to vector<2x64xf32>
    %268 = arith.subf %267, %260 : vector<2x64xf32>
    %269 = arith.mulf %268, %266 : vector<2x64xf32>
    %270 = arith.mulf %260, %248 : vector<2x64xf32>
    %271 = arith.addf %269, %270 : vector<2x64xf32>
    %c0_49 = arith.constant 0 : index
    %c0_50 = arith.constant 0 : index
    %272 = vector.load %arg9[%c0_49, %c0_50] : memref<512x12xf32, #tpu.memory_space<vmem>>, vector<64x12xf32>
    %cst_51 = arith.constant 0.000000e+00 : f32
    %273 = vector.broadcast %cst_51 : f32 to vector<2x64xf32>
    %274 = arith.maximumf %271, %273 : vector<2x64xf32>
    %cst_52 = arith.constant dense<0.000000e+00> : vector<2x12xf32>
    %275 = tpu.matmul %274, %272, %cst_52 {dimension_numbers = #tpu.dot_dimension_numbers<[1], [0], [0], [1], [0, 0, 1, 1], [], []>} : vector<2x64xf32>, vector<64x12xf32>, vector<2x12xf32> -> vector<2x12xf32>
    %276 = arith.addf %247, %275 : vector<2x12xf32>
    %277 = vector.extract_strided_slice %240 {offsets = [2, 0], sizes = [2, 192], strides = [1, 1]} : vector<16x192xf32> to vector<2x192xf32>
    %cst_53 = arith.constant dense<0.000000e+00> : vector<2x192xf32>
    %278 = tpu.matmul %271, %241, %cst_53 {dimension_numbers = #tpu.dot_dimension_numbers<[1], [0], [0], [1], [0, 0, 1, 1], [], []>} : vector<2x64xf32>, vector<64x192xf32>, vector<2x192xf32> -> vector<2x192xf32>
    %279 = vector.extract_strided_slice %277 {offsets = [0, 0], sizes = [2, 128], strides = [1, 1]} : vector<2x192xf32> to vector<2x128xf32>
    %280 = vector.extract_strided_slice %278 {offsets = [0, 0], sizes = [2, 128], strides = [1, 1]} : vector<2x192xf32> to vector<2x128xf32>
    %281 = arith.addf %279, %280 : vector<2x128xf32>
    %282 = arith.negf %281 : vector<2x128xf32>
    %283 = math.exp %282 : vector<2x128xf32>
    %cst_54 = arith.constant 1.000000e+00 : f32
    %284 = vector.broadcast %cst_54 : f32 to vector<2x128xf32>
    %285 = arith.addf %284, %283 : vector<2x128xf32>
    %286 = arith.divf %284, %285 : vector<2x128xf32>
    %287 = vector.extract_strided_slice %286 {offsets = [0, 0], sizes = [2, 64], strides = [1, 1]} : vector<2x128xf32> to vector<2x64xf32>
    %288 = vector.extract_strided_slice %286 {offsets = [0, 64], sizes = [2, 64], strides = [1, 1]} : vector<2x128xf32> to vector<2x64xf32>
    %289 = vector.extract_strided_slice %277 {offsets = [0, 128], sizes = [2, 64], strides = [1, 1]} : vector<2x192xf32> to vector<2x64xf32>
    %290 = vector.extract_strided_slice %278 {offsets = [0, 128], sizes = [2, 64], strides = [1, 1]} : vector<2x192xf32> to vector<2x64xf32>
    %291 = arith.addf %290, %244 : vector<2x64xf32>
    %292 = arith.mulf %287, %291 : vector<2x64xf32>
    %293 = arith.addf %289, %292 : vector<2x64xf32>
    %294 = math.tanh %293 : vector<2x64xf32>
    %cst_55 = arith.constant 1.000000e+00 : f32
    %295 = vector.broadcast %cst_55 : f32 to vector<2x64xf32>
    %296 = arith.subf %295, %288 : vector<2x64xf32>
    %297 = arith.mulf %296, %294 : vector<2x64xf32>
    %298 = arith.mulf %288, %271 : vector<2x64xf32>
    %299 = arith.addf %297, %298 : vector<2x64xf32>
    %c64 = arith.constant 64 : index
    %c0_56 = arith.constant 0 : index
    %300 = vector.load %arg9[%c64, %c0_56] : memref<512x12xf32, #tpu.memory_space<vmem>>, vector<64x12xf32>
    %cst_57 = arith.constant 0.000000e+00 : f32
    %301 = vector.broadcast %cst_57 : f32 to vector<2x64xf32>
    %302 = arith.maximumf %299, %301 : vector<2x64xf32>
    %cst_58 = arith.constant dense<0.000000e+00> : vector<2x12xf32>
    %303 = tpu.matmul %302, %300, %cst_58 {dimension_numbers = #tpu.dot_dimension_numbers<[1], [0], [0], [1], [0, 0, 1, 1], [], []>} : vector<2x64xf32>, vector<64x12xf32>, vector<2x12xf32> -> vector<2x12xf32>
    %304 = arith.addf %276, %303 : vector<2x12xf32>
    %305 = vector.extract_strided_slice %240 {offsets = [4, 0], sizes = [2, 192], strides = [1, 1]} : vector<16x192xf32> to vector<2x192xf32>
    %cst_59 = arith.constant dense<0.000000e+00> : vector<2x192xf32>
    %306 = tpu.matmul %299, %241, %cst_59 {dimension_numbers = #tpu.dot_dimension_numbers<[1], [0], [0], [1], [0, 0, 1, 1], [], []>} : vector<2x64xf32>, vector<64x192xf32>, vector<2x192xf32> -> vector<2x192xf32>
    %307 = vector.extract_strided_slice %305 {offsets = [0, 0], sizes = [2, 128], strides = [1, 1]} : vector<2x192xf32> to vector<2x128xf32>
    %308 = vector.extract_strided_slice %306 {offsets = [0, 0], sizes = [2, 128], strides = [1, 1]} : vector<2x192xf32> to vector<2x128xf32>
    %309 = arith.addf %307, %308 : vector<2x128xf32>
    %310 = arith.negf %309 : vector<2x128xf32>
    %311 = math.exp %310 : vector<2x128xf32>
    %cst_60 = arith.constant 1.000000e+00 : f32
    %312 = vector.broadcast %cst_60 : f32 to vector<2x128xf32>
    %313 = arith.addf %312, %311 : vector<2x128xf32>
    %314 = arith.divf %312, %313 : vector<2x128xf32>
    %315 = vector.extract_strided_slice %314 {offsets = [0, 0], sizes = [2, 64], strides = [1, 1]} : vector<2x128xf32> to vector<2x64xf32>
    %316 = vector.extract_strided_slice %314 {offsets = [0, 64], sizes = [2, 64], strides = [1, 1]} : vector<2x128xf32> to vector<2x64xf32>
    %317 = vector.extract_strided_slice %305 {offsets = [0, 128], sizes = [2, 64], strides = [1, 1]} : vector<2x192xf32> to vector<2x64xf32>
    %318 = vector.extract_strided_slice %306 {offsets = [0, 128], sizes = [2, 64], strides = [1, 1]} : vector<2x192xf32> to vector<2x64xf32>
    %319 = arith.addf %318, %244 : vector<2x64xf32>
    %320 = arith.mulf %315, %319 : vector<2x64xf32>
    %321 = arith.addf %317, %320 : vector<2x64xf32>
    %322 = math.tanh %321 : vector<2x64xf32>
    %cst_61 = arith.constant 1.000000e+00 : f32
    %323 = vector.broadcast %cst_61 : f32 to vector<2x64xf32>
    %324 = arith.subf %323, %316 : vector<2x64xf32>
    %325 = arith.mulf %324, %322 : vector<2x64xf32>
    %326 = arith.mulf %316, %299 : vector<2x64xf32>
    %327 = arith.addf %325, %326 : vector<2x64xf32>
    %c128 = arith.constant 128 : index
    %c0_62 = arith.constant 0 : index
    %328 = vector.load %arg9[%c128, %c0_62] : memref<512x12xf32, #tpu.memory_space<vmem>>, vector<64x12xf32>
    %cst_63 = arith.constant 0.000000e+00 : f32
    %329 = vector.broadcast %cst_63 : f32 to vector<2x64xf32>
    %330 = arith.maximumf %327, %329 : vector<2x64xf32>
    %cst_64 = arith.constant dense<0.000000e+00> : vector<2x12xf32>
    %331 = tpu.matmul %330, %328, %cst_64 {dimension_numbers = #tpu.dot_dimension_numbers<[1], [0], [0], [1], [0, 0, 1, 1], [], []>} : vector<2x64xf32>, vector<64x12xf32>, vector<2x12xf32> -> vector<2x12xf32>
    %332 = arith.addf %304, %331 : vector<2x12xf32>
    %333 = vector.extract_strided_slice %240 {offsets = [6, 0], sizes = [2, 192], strides = [1, 1]} : vector<16x192xf32> to vector<2x192xf32>
    %cst_65 = arith.constant dense<0.000000e+00> : vector<2x192xf32>
    %334 = tpu.matmul %327, %241, %cst_65 {dimension_numbers = #tpu.dot_dimension_numbers<[1], [0], [0], [1], [0, 0, 1, 1], [], []>} : vector<2x64xf32>, vector<64x192xf32>, vector<2x192xf32> -> vector<2x192xf32>
    %335 = vector.extract_strided_slice %333 {offsets = [0, 0], sizes = [2, 128], strides = [1, 1]} : vector<2x192xf32> to vector<2x128xf32>
    %336 = vector.extract_strided_slice %334 {offsets = [0, 0], sizes = [2, 128], strides = [1, 1]} : vector<2x192xf32> to vector<2x128xf32>
    %337 = arith.addf %335, %336 : vector<2x128xf32>
    %338 = arith.negf %337 : vector<2x128xf32>
    %339 = math.exp %338 : vector<2x128xf32>
    %cst_66 = arith.constant 1.000000e+00 : f32
    %340 = vector.broadcast %cst_66 : f32 to vector<2x128xf32>
    %341 = arith.addf %340, %339 : vector<2x128xf32>
    %342 = arith.divf %340, %341 : vector<2x128xf32>
    %343 = vector.extract_strided_slice %342 {offsets = [0, 0], sizes = [2, 64], strides = [1, 1]} : vector<2x128xf32> to vector<2x64xf32>
    %344 = vector.extract_strided_slice %342 {offsets = [0, 64], sizes = [2, 64], strides = [1, 1]} : vector<2x128xf32> to vector<2x64xf32>
    %345 = vector.extract_strided_slice %333 {offsets = [0, 128], sizes = [2, 64], strides = [1, 1]} : vector<2x192xf32> to vector<2x64xf32>
    %346 = vector.extract_strided_slice %334 {offsets = [0, 128], sizes = [2, 64], strides = [1, 1]} : vector<2x192xf32> to vector<2x64xf32>
    %347 = arith.addf %346, %244 : vector<2x64xf32>
    %348 = arith.mulf %343, %347 : vector<2x64xf32>
    %349 = arith.addf %345, %348 : vector<2x64xf32>
    %350 = math.tanh %349 : vector<2x64xf32>
    %cst_67 = arith.constant 1.000000e+00 : f32
    %351 = vector.broadcast %cst_67 : f32 to vector<2x64xf32>
    %352 = arith.subf %351, %344 : vector<2x64xf32>
    %353 = arith.mulf %352, %350 : vector<2x64xf32>
    %354 = arith.mulf %344, %327 : vector<2x64xf32>
    %355 = arith.addf %353, %354 : vector<2x64xf32>
    %c192 = arith.constant 192 : index
    %c0_68 = arith.constant 0 : index
    %356 = vector.load %arg9[%c192, %c0_68] : memref<512x12xf32, #tpu.memory_space<vmem>>, vector<64x12xf32>
    %cst_69 = arith.constant 0.000000e+00 : f32
    %357 = vector.broadcast %cst_69 : f32 to vector<2x64xf32>
    %358 = arith.maximumf %355, %357 : vector<2x64xf32>
    %cst_70 = arith.constant dense<0.000000e+00> : vector<2x12xf32>
    %359 = tpu.matmul %358, %356, %cst_70 {dimension_numbers = #tpu.dot_dimension_numbers<[1], [0], [0], [1], [0, 0, 1, 1], [], []>} : vector<2x64xf32>, vector<64x12xf32>, vector<2x12xf32> -> vector<2x12xf32>
    %360 = arith.addf %332, %359 : vector<2x12xf32>
    %361 = vector.extract_strided_slice %240 {offsets = [8, 0], sizes = [2, 192], strides = [1, 1]} : vector<16x192xf32> to vector<2x192xf32>
    %cst_71 = arith.constant dense<0.000000e+00> : vector<2x192xf32>
    %362 = tpu.matmul %355, %241, %cst_71 {dimension_numbers = #tpu.dot_dimension_numbers<[1], [0], [0], [1], [0, 0, 1, 1], [], []>} : vector<2x64xf32>, vector<64x192xf32>, vector<2x192xf32> -> vector<2x192xf32>
    %363 = vector.extract_strided_slice %361 {offsets = [0, 0], sizes = [2, 128], strides = [1, 1]} : vector<2x192xf32> to vector<2x128xf32>
    %364 = vector.extract_strided_slice %362 {offsets = [0, 0], sizes = [2, 128], strides = [1, 1]} : vector<2x192xf32> to vector<2x128xf32>
    %365 = arith.addf %363, %364 : vector<2x128xf32>
    %366 = arith.negf %365 : vector<2x128xf32>
    %367 = math.exp %366 : vector<2x128xf32>
    %cst_72 = arith.constant 1.000000e+00 : f32
    %368 = vector.broadcast %cst_72 : f32 to vector<2x128xf32>
    %369 = arith.addf %368, %367 : vector<2x128xf32>
    %370 = arith.divf %368, %369 : vector<2x128xf32>
    %371 = vector.extract_strided_slice %370 {offsets = [0, 0], sizes = [2, 64], strides = [1, 1]} : vector<2x128xf32> to vector<2x64xf32>
    %372 = vector.extract_strided_slice %370 {offsets = [0, 64], sizes = [2, 64], strides = [1, 1]} : vector<2x128xf32> to vector<2x64xf32>
    %373 = vector.extract_strided_slice %361 {offsets = [0, 128], sizes = [2, 64], strides = [1, 1]} : vector<2x192xf32> to vector<2x64xf32>
    %374 = vector.extract_strided_slice %362 {offsets = [0, 128], sizes = [2, 64], strides = [1, 1]} : vector<2x192xf32> to vector<2x64xf32>
    %375 = arith.addf %374, %244 : vector<2x64xf32>
    %376 = arith.mulf %371, %375 : vector<2x64xf32>
    %377 = arith.addf %373, %376 : vector<2x64xf32>
    %378 = math.tanh %377 : vector<2x64xf32>
    %cst_73 = arith.constant 1.000000e+00 : f32
    %379 = vector.broadcast %cst_73 : f32 to vector<2x64xf32>
    %380 = arith.subf %379, %372 : vector<2x64xf32>
    %381 = arith.mulf %380, %378 : vector<2x64xf32>
    %382 = arith.mulf %372, %355 : vector<2x64xf32>
    %383 = arith.addf %381, %382 : vector<2x64xf32>
    %c256 = arith.constant 256 : index
    %c0_74 = arith.constant 0 : index
    %384 = vector.load %arg9[%c256, %c0_74] : memref<512x12xf32, #tpu.memory_space<vmem>>, vector<64x12xf32>
    %cst_75 = arith.constant 0.000000e+00 : f32
    %385 = vector.broadcast %cst_75 : f32 to vector<2x64xf32>
    %386 = arith.maximumf %383, %385 : vector<2x64xf32>
    %cst_76 = arith.constant dense<0.000000e+00> : vector<2x12xf32>
    %387 = tpu.matmul %386, %384, %cst_76 {dimension_numbers = #tpu.dot_dimension_numbers<[1], [0], [0], [1], [0, 0, 1, 1], [], []>} : vector<2x64xf32>, vector<64x12xf32>, vector<2x12xf32> -> vector<2x12xf32>
    %388 = arith.addf %360, %387 : vector<2x12xf32>
    %389 = vector.extract_strided_slice %240 {offsets = [10, 0], sizes = [2, 192], strides = [1, 1]} : vector<16x192xf32> to vector<2x192xf32>
    %cst_77 = arith.constant dense<0.000000e+00> : vector<2x192xf32>
    %390 = tpu.matmul %383, %241, %cst_77 {dimension_numbers = #tpu.dot_dimension_numbers<[1], [0], [0], [1], [0, 0, 1, 1], [], []>} : vector<2x64xf32>, vector<64x192xf32>, vector<2x192xf32> -> vector<2x192xf32>
    %391 = vector.extract_strided_slice %389 {offsets = [0, 0], sizes = [2, 128], strides = [1, 1]} : vector<2x192xf32> to vector<2x128xf32>
    %392 = vector.extract_strided_slice %390 {offsets = [0, 0], sizes = [2, 128], strides = [1, 1]} : vector<2x192xf32> to vector<2x128xf32>
    %393 = arith.addf %391, %392 : vector<2x128xf32>
    %394 = arith.negf %393 : vector<2x128xf32>
    %395 = math.exp %394 : vector<2x128xf32>
    %cst_78 = arith.constant 1.000000e+00 : f32
    %396 = vector.broadcast %cst_78 : f32 to vector<2x128xf32>
    %397 = arith.addf %396, %395 : vector<2x128xf32>
    %398 = arith.divf %396, %397 : vector<2x128xf32>
    %399 = vector.extract_strided_slice %398 {offsets = [0, 0], sizes = [2, 64], strides = [1, 1]} : vector<2x128xf32> to vector<2x64xf32>
    %400 = vector.extract_strided_slice %398 {offsets = [0, 64], sizes = [2, 64], strides = [1, 1]} : vector<2x128xf32> to vector<2x64xf32>
    %401 = vector.extract_strided_slice %389 {offsets = [0, 128], sizes = [2, 64], strides = [1, 1]} : vector<2x192xf32> to vector<2x64xf32>
    %402 = vector.extract_strided_slice %390 {offsets = [0, 128], sizes = [2, 64], strides = [1, 1]} : vector<2x192xf32> to vector<2x64xf32>
    %403 = arith.addf %402, %244 : vector<2x64xf32>
    %404 = arith.mulf %399, %403 : vector<2x64xf32>
    %405 = arith.addf %401, %404 : vector<2x64xf32>
    %406 = math.tanh %405 : vector<2x64xf32>
    %cst_79 = arith.constant 1.000000e+00 : f32
    %407 = vector.broadcast %cst_79 : f32 to vector<2x64xf32>
    %408 = arith.subf %407, %400 : vector<2x64xf32>
    %409 = arith.mulf %408, %406 : vector<2x64xf32>
    %410 = arith.mulf %400, %383 : vector<2x64xf32>
    %411 = arith.addf %409, %410 : vector<2x64xf32>
    %c320 = arith.constant 320 : index
    %c0_80 = arith.constant 0 : index
    %412 = vector.load %arg9[%c320, %c0_80] : memref<512x12xf32, #tpu.memory_space<vmem>>, vector<64x12xf32>
    %cst_81 = arith.constant 0.000000e+00 : f32
    %413 = vector.broadcast %cst_81 : f32 to vector<2x64xf32>
    %414 = arith.maximumf %411, %413 : vector<2x64xf32>
    %cst_82 = arith.constant dense<0.000000e+00> : vector<2x12xf32>
    %415 = tpu.matmul %414, %412, %cst_82 {dimension_numbers = #tpu.dot_dimension_numbers<[1], [0], [0], [1], [0, 0, 1, 1], [], []>} : vector<2x64xf32>, vector<64x12xf32>, vector<2x12xf32> -> vector<2x12xf32>
    %416 = arith.addf %388, %415 : vector<2x12xf32>
    %417 = vector.extract_strided_slice %240 {offsets = [12, 0], sizes = [2, 192], strides = [1, 1]} : vector<16x192xf32> to vector<2x192xf32>
    %cst_83 = arith.constant dense<0.000000e+00> : vector<2x192xf32>
    %418 = tpu.matmul %411, %241, %cst_83 {dimension_numbers = #tpu.dot_dimension_numbers<[1], [0], [0], [1], [0, 0, 1, 1], [], []>} : vector<2x64xf32>, vector<64x192xf32>, vector<2x192xf32> -> vector<2x192xf32>
    %419 = vector.extract_strided_slice %417 {offsets = [0, 0], sizes = [2, 128], strides = [1, 1]} : vector<2x192xf32> to vector<2x128xf32>
    %420 = vector.extract_strided_slice %418 {offsets = [0, 0], sizes = [2, 128], strides = [1, 1]} : vector<2x192xf32> to vector<2x128xf32>
    %421 = arith.addf %419, %420 : vector<2x128xf32>
    %422 = arith.negf %421 : vector<2x128xf32>
    %423 = math.exp %422 : vector<2x128xf32>
    %cst_84 = arith.constant 1.000000e+00 : f32
    %424 = vector.broadcast %cst_84 : f32 to vector<2x128xf32>
    %425 = arith.addf %424, %423 : vector<2x128xf32>
    %426 = arith.divf %424, %425 : vector<2x128xf32>
    %427 = vector.extract_strided_slice %426 {offsets = [0, 0], sizes = [2, 64], strides = [1, 1]} : vector<2x128xf32> to vector<2x64xf32>
    %428 = vector.extract_strided_slice %426 {offsets = [0, 64], sizes = [2, 64], strides = [1, 1]} : vector<2x128xf32> to vector<2x64xf32>
    %429 = vector.extract_strided_slice %417 {offsets = [0, 128], sizes = [2, 64], strides = [1, 1]} : vector<2x192xf32> to vector<2x64xf32>
    %430 = vector.extract_strided_slice %418 {offsets = [0, 128], sizes = [2, 64], strides = [1, 1]} : vector<2x192xf32> to vector<2x64xf32>
    %431 = arith.addf %430, %244 : vector<2x64xf32>
    %432 = arith.mulf %427, %431 : vector<2x64xf32>
    %433 = arith.addf %429, %432 : vector<2x64xf32>
    %434 = math.tanh %433 : vector<2x64xf32>
    %cst_85 = arith.constant 1.000000e+00 : f32
    %435 = vector.broadcast %cst_85 : f32 to vector<2x64xf32>
    %436 = arith.subf %435, %428 : vector<2x64xf32>
    %437 = arith.mulf %436, %434 : vector<2x64xf32>
    %438 = arith.mulf %428, %411 : vector<2x64xf32>
    %439 = arith.addf %437, %438 : vector<2x64xf32>
    %c384 = arith.constant 384 : index
    %c0_86 = arith.constant 0 : index
    %440 = vector.load %arg9[%c384, %c0_86] : memref<512x12xf32, #tpu.memory_space<vmem>>, vector<64x12xf32>
    %cst_87 = arith.constant 0.000000e+00 : f32
    %441 = vector.broadcast %cst_87 : f32 to vector<2x64xf32>
    %442 = arith.maximumf %439, %441 : vector<2x64xf32>
    %cst_88 = arith.constant dense<0.000000e+00> : vector<2x12xf32>
    %443 = tpu.matmul %442, %440, %cst_88 {dimension_numbers = #tpu.dot_dimension_numbers<[1], [0], [0], [1], [0, 0, 1, 1], [], []>} : vector<2x64xf32>, vector<64x12xf32>, vector<2x12xf32> -> vector<2x12xf32>
    %444 = arith.addf %416, %443 : vector<2x12xf32>
    %445 = vector.extract_strided_slice %240 {offsets = [14, 0], sizes = [2, 192], strides = [1, 1]} : vector<16x192xf32> to vector<2x192xf32>
    %cst_89 = arith.constant dense<0.000000e+00> : vector<2x192xf32>
    %446 = tpu.matmul %439, %241, %cst_89 {dimension_numbers = #tpu.dot_dimension_numbers<[1], [0], [0], [1], [0, 0, 1, 1], [], []>} : vector<2x64xf32>, vector<64x192xf32>, vector<2x192xf32> -> vector<2x192xf32>
    %447 = vector.extract_strided_slice %445 {offsets = [0, 0], sizes = [2, 128], strides = [1, 1]} : vector<2x192xf32> to vector<2x128xf32>
    %448 = vector.extract_strided_slice %446 {offsets = [0, 0], sizes = [2, 128], strides = [1, 1]} : vector<2x192xf32> to vector<2x128xf32>
    %449 = arith.addf %447, %448 : vector<2x128xf32>
    %450 = arith.negf %449 : vector<2x128xf32>
    %451 = math.exp %450 : vector<2x128xf32>
    %cst_90 = arith.constant 1.000000e+00 : f32
    %452 = vector.broadcast %cst_90 : f32 to vector<2x128xf32>
    %453 = arith.addf %452, %451 : vector<2x128xf32>
    %454 = arith.divf %452, %453 : vector<2x128xf32>
    %455 = vector.extract_strided_slice %454 {offsets = [0, 0], sizes = [2, 64], strides = [1, 1]} : vector<2x128xf32> to vector<2x64xf32>
    %456 = vector.extract_strided_slice %454 {offsets = [0, 64], sizes = [2, 64], strides = [1, 1]} : vector<2x128xf32> to vector<2x64xf32>
    %457 = vector.extract_strided_slice %445 {offsets = [0, 128], sizes = [2, 64], strides = [1, 1]} : vector<2x192xf32> to vector<2x64xf32>
    %458 = vector.extract_strided_slice %446 {offsets = [0, 128], sizes = [2, 64], strides = [1, 1]} : vector<2x192xf32> to vector<2x64xf32>
    %459 = arith.addf %458, %244 : vector<2x64xf32>
    %460 = arith.mulf %455, %459 : vector<2x64xf32>
    %461 = arith.addf %457, %460 : vector<2x64xf32>
    %462 = math.tanh %461 : vector<2x64xf32>
    %cst_91 = arith.constant 1.000000e+00 : f32
    %463 = vector.broadcast %cst_91 : f32 to vector<2x64xf32>
    %464 = arith.subf %463, %456 : vector<2x64xf32>
    %465 = arith.mulf %464, %462 : vector<2x64xf32>
    %466 = arith.mulf %456, %439 : vector<2x64xf32>
    %467 = arith.addf %465, %466 : vector<2x64xf32>
    %c448 = arith.constant 448 : index
    %c0_92 = arith.constant 0 : index
    %468 = vector.load %arg9[%c448, %c0_92] : memref<512x12xf32, #tpu.memory_space<vmem>>, vector<64x12xf32>
    %cst_93 = arith.constant 0.000000e+00 : f32
    %469 = vector.broadcast %cst_93 : f32 to vector<2x64xf32>
    %470 = arith.maximumf %467, %469 : vector<2x64xf32>
    %cst_94 = arith.constant dense<0.000000e+00> : vector<2x12xf32>
    %471 = tpu.matmul %470, %468, %cst_94 {dimension_numbers = #tpu.dot_dimension_numbers<[1], [0], [0], [1], [0, 0, 1, 1], [], []>} : vector<2x64xf32>, vector<64x12xf32>, vector<2x12xf32> -> vector<2x12xf32>
    %472 = arith.addf %444, %471 : vector<2x12xf32>
    %c0_95 = arith.constant 0 : index
    %c0_96 = arith.constant 0 : index
    %473 = vector.load %arg11[%c0_95, %c0_96] : memref<2x12xf32, #tpu.memory_space<vmem>>, vector<2x12xf32>
    tpu.vector_store %arg11[%c0_95, %c0_96], %472 {strides = array<i32>} : memref<2x12xf32, #tpu.memory_space<vmem>>, vector<2x12xf32>,
    return
  }
}

</mosaic_0001>

<bundles_post_ra>
// kernel: mv_gru_forward.1
= control target key start
LH: loop header
LB: loop body
LE: loop exit
PB: predicated region body
PF: predicated region fallthrough
CT: control target
= control target key end

     0   :  { %v3510_v3 = vmov 0.0   ;;  %vm54_vm0 = vcmask 64512   ;;  %v44_v28 = vlaneseq  ;;  %vm161_vm1 = vcmask 523264   ;;  %s4555_s3 = inlined_call_operand.vmem [shape: f32[64,192], index: 3, kind: input, shape index: {}]   ;;  %s4556_s1 = inlined_call_operand.vmem [shape: f32[8,192], index: 1, kind: input, shape index: {}]   ;;  %s4557_s0 = inlined_call_operand.vmem [shape: f32[16,8], index: 0, kind: input, shape index: {}]   ;;  %s4558_s2 = inlined_call_operand.vmem [shape: f32[1,192], index: 2, kind: input, shape index: {}]   ;;  %s4559_s4 = inlined_call_operand.vmem [shape: f32[1,64], index: 4, kind: input, shape index: {}]   ;;  %s4560_s5 = inlined_call_operand.vmem [shape: f32[128,192], index: 5, kind: input, shape index: {}]   ;;  %s4561_s7 = inlined_call_operand.vmem [shape: f32[64,192], index: 7, kind: input, shape index: {}]   ;;  %s4562_s6 = inlined_call_operand.vmem [shape: f32[1,192], index: 6, kind: input, shape index: {}]   ;;  %s4563_s8 = inlined_call_operand.vmem [shape: f32[1,64], index: 8, kind: input, shape index: {}]   ;;  %s4564_s9 = inlined_call_operand.vmem [shape: f32[512,12], index: 9, kind: input, shape index: {}]   ;;  %s4565_s10 = inlined_call_operand.vmem [shape: f32[1,12], index: 10, kind: input, shape index: {}]   ;;  %s4566_s11 = inlined_call_operand.vmem [shape: f32[2,12], index: 11, kind: output, shape index: {}]  }
   0x1   :  { %v139_v0 = vld [vmem:[%s4555_s3 + $0x8] sm:$0xff]  ;;  %v141_v1 = vld [vmem:[%s4555_s3 + $0x18] sm:$0xff]  ;;  %v138_v2 = vld [vmem:[%s4555_s3] sm:$0xff]  ;;  %125 = vmatprep.mubr.f32.mxu0 %v3510_v3  ;;  %229 = vmatprep.mubr.f32.mxu1 %v3510_v3  ;;  %vm981_vm2 = vcmask 261120   ;;  %vm984_vm3 = vcmask 785408   ;;  %vm1055_vm4 = vcmask 1043456  }
   0x2   :  { %v3585_v4 = vpack.c.bf16 %v141_v1, %v139_v0  ;;  %v140_v5 = vld [vmem:[%s4555_s3 + $0x10] sm:$0xff]  ;;  %v143_v6 = vld [vmem:[%s4555_s3 + $0x28] sm:$0xff]  ;;  %v145_v7 = vld [vmem:[%s4555_s3 + $0x38] sm:$0xff]  ;;  %v3679_v29 = vshrl.u32 %v44_v28, 7  ;;  %vm1053_vm5 = vcmask 1041408   ;;  %vm1057_vm6 = vcmask 1045504  }
   0x3   :  { %v3596_v8 = vpack.c.bf16 %v140_v5, %v138_v2  ;;  %v3598_v9 = vpack.c.bf16 %v145_v7, %v143_v6  ;;  %v142_v10 = vld [vmem:[%s4555_s3 + $0x20] sm:$0xff]  ;;  %v144_v11 = vld [vmem:[%s4555_s3 + $0x30] sm:$0xff]  ;;  %v147_v12 = vld [vmem:[%s4555_s3 + $0x48] sm:$0xff]  ;;  %vm3513_vm7 = vmmov 0   ;;  %vm2708_vm8 = vcmask 91136  }
   0x4   :  { %2982 = vmatprep.subr.bf16.mxu1 %v3585_v4  ;;  %v149_v13 = vld [vmem:[%s4555_s3 + $0x58] sm:$0xff]  ;;  %v3614_v14 = vpack.c.bf16 %v144_v11, %v142_v10  ;;  %v41_v15 = vld [vmem:[%s4556_s1 + $0x8] sm:$0xff]  ;;  %v40_v16 = vld [vmem:[%s4556_s1] sm:$0xff]  ;;  %v46_v31 = vsub.s32 0, %v3679_v29  ;;  %v50_v42 = vsub.s32 1, %v3679_v29 }
   0x5   :  { %2984 = vmatpush1.bf16.msra.mxu1 %v3596_v8  ;;  %v3623_v17 = vpack.c.bf16 %v149_v13, %v147_v12  ;;  %v146_v18 = vld [vmem:[%s4555_s3 + $0x40] sm:$0xff]  ;;  %v148_v19 = vld [vmem:[%s4555_s3 + $0x50] sm:$0xff]  ;;  %61 = vmatprep.subr.mxu0 %v41_v15  ;;  %v151_v21 = vld [vmem:[%s4555_s3 + $0x68] sm:$0xff] }
   0x6   :  { %2986 = vmatprep.subr.bf16.mxu1 %v3598_v9  ;;  %v38_v20 = vld [vmem:[%s4557_s0] sm:$0xff]  ;;  %62 = vmatpush1.msra.mxu0 %v40_v16  ;;  %v153_v22 = vld [vmem:[%s4555_s3 + $0x78] sm:$0xff]  ;;  %v3643_v23 = vpack.c.bf16 %v148_v19, %v146_v18  ;;  %v152_v26 = vld [vmem:[%s4555_s3 + $0x70] sm:$0xff] }
   0x7   :  { %2714 = vmatmul.mubr.msk.f32.vlgmr.msra.gmra.mrb[0].mxu0 %vm54_vm0, %v38_v20  ;;  %2998 = vmatprep.subr.bf16.mxu0 %v3585_v4  ;;  %v3647_v24 = vpack.c.bf16 %v153_v22, %v151_v21  ;;  %v150_v25 = vld [vmem:[%s4555_s3 + $0x60] sm:$0xff]  ;;  %v39_v50 = vld [vmem:[%s4557_s0 + $0x8] sm:$0xff] }
   0x8   :  { %3000 = vmatpush1.bf16.msra.mxu0 %v3596_v8  ;;  %131 = vmatprep.mubr.f32.mxu0 %v3510_v3  ;;  %v3658_v27 = vpack.c.bf16 %v152_v26, %v150_v25  ;;  %v42_v33 = vld [vmem:[%s4558_s2] sm:$0x3] }
   0x9   :  { %2988 = vmatpush1.bf16.msra.mxu1 %v3614_v14  ;;  %3002 = vmatprep.subr.bf16.mxu0 %v3598_v9  ;;  %v3687_v34 = vrot.slane %v42_v33, %v46_v31  ;;  %v3697_v43 = vld [vmem:[%s4559_s4] ss:$0 sm:$0xff]  ;;  %v3701_v44 = vrot.slane %v42_v33, %v50_v42  ;;  %s3511_s4 = smov 64  }
   0xa   :  { %2990 = vmatprep.subr.bf16.mxu1 %v3623_v17 }
   0xb   :  { %2715 = vmatmul.mubr.msk.f32.gmra.mrb[2].mxu0 %vm54_vm0, %v39_v50 }
   0xc   :  { %3004 = vmatpush1.bf16.msra.mxu0 %v3614_v14  ;;  %324 = vmatprep.mubr.f32.mxu0 %v3510_v3 }
   0xd   :  { %2992 = vmatpush1.bf16.msra.mxu1 %v3643_v23  ;;  %3006 = vmatprep.subr.bf16.mxu0 %v3623_v17 }
   0xe   :  { %2994 = vmatprep.subr.bf16.mxu1 %v3647_v24 }
  0x10   :  { %3008 = vmatpush1.bf16.msra.mxu0 %v3643_v23 }
  0x11   :  { %2996 = vmatpush1.bf16.msra.mxu1 %v3658_v27  ;;  %3010 = vmatprep.subr.bf16.mxu0 %v3647_v24 }
  0x12   :  { %3014 = vmatprep.subr.bf16.mxu1 %v3585_v4 }
  0x14   :  { %230 = vmatmul.mubr.f32.vlgmr.msra.gmra.mrb[0].mxu1 %v3510_v3  ;;  %3012 = vmatpush1.bf16.msra.mxu0 %v3658_v27 }
  0x15   :  { %3016 = vmatpush1.bf16.msra.mxu1 %v3596_v8  ;;  %428 = vmatprep.mubr.f32.mxu1 %v3510_v3 }
  0x16   :  { %3018 = vmatprep.subr.bf16.mxu1 %v3598_v9  ;;  %3030 = vmatprep.subr.bf16.mxu0 %v3585_v4 }
  0x19   :  { %3020 = vmatpush1.bf16.msra.mxu1 %v3614_v14 }
  0x1a   :  { %3022 = vmatprep.subr.bf16.mxu1 %v3623_v17 }
  0x1d   :  { %3024 = vmatpush1.bf16.msra.mxu1 %v3643_v23 }
  0x1e   :  { %3026 = vmatprep.subr.bf16.mxu1 %v3647_v24 }
  0x21   :  { %3028 = vmatpush1.bf16.msra.mxu1 %v3658_v27 }
  0x22   :  { %3046 = vmatprep.subr.bf16.mxu1 %v3585_v4 }
  0xda   :  { %v127_v30 = vpop.f32.mrb[0].mxu0 }
  0xdb   :  { %v129_v32 = vpop.f32.mrb[1].mxu0  ;;  %v3690_v35 = vadd.f32 %v127_v30, %v3687_v34 }
  0xdc   :  { %v3705_v47 = vadd.f32 %v129_v32, %v3701_v44 }
  0xde   :  { %v3718_v57 = vpop.f32.mrb[2].mxu0 }
  0xdf   :  { %v3720_v58 = vpop.f32.mrb[3].mxu0 }
  0xe7   :  { %v231_v36 = vpop.f32.mrb[0].mxu1 }
  0xe8   :  { %v236_v37 = vadd.f32 %v231_v36, %v3690_v35  ;;  %v233_v38 = vpop.f32.mrb[1].mxu1 }
  0xe9   :  { %v243_v45 = vadd.f32 %v3697_v43, %v233_v38 }
  0xea   :  { %v2717_v39 = vmul.f32 -1.442695, %v236_v37 }
  0xec   :  { %3414 = vpow2.f32 %v2717_v39 }
  0xf6   :  { %v3415_v40 = vpop.eup %3414 }
  0xf7   :  { %v240_v41 = vadd.f32 1.0, %v3415_v40 }
  0xf9   :  { %3416 = vrcp.f32 %v240_v41 }
 0x103   :  { %v3417_v46 = vpop.eup %3416 }
 0x104   :  { %v244_v48 = vmul.f32 %v3417_v46, %v243_v45  ;;  %v247_v52 = vsub.f32 1.0, %v3417_v46  ;;  %v253_v54 = vmul.f32 0.0, %v3417_v46 }
 0x106   :  { %v245_v49 = vadd.f32 %v244_v48, %v3705_v47 }
 0x108   :  { %3418 = vtanh.f32 %v245_v49 }
 0x112   :  { %v3419_v51 = vpop.eup %3418 }
 0x113   :  { %249 = vrot.lane.b32.xlu0 %v3419_v51, %s3511_s4 }
 0x185   :  { %v250_v53 = vpop.permute.xlu0 %249 }
 0x186   :  { %v252_v55 = vmul.f32 %v250_v53, %v247_v52 }
 0x188   :  { %v3714_v56 = vadd.f32 %v253_v54, %v252_v55 }
 0x18a   :  { %256 = vrot.lane.b32.xlu0 %v3714_v56, %s3511_s4  ;;  %v354_v15 = vrot.slane %v3714_v56, 6 }
 0x1fc   :  { %v3722_v59 = vpop.permute.xlu0 %256 }
 0x1fd   :  { %2718 = vmatmul.mubr.msk.f32.vlgmr.msra.gmra.mrb[4].mxu0 %vm161_vm1, %v3722_v59 }
 0x1fe   :  { %3032 = vmatpush1.bf16.msra.mxu0 %v3596_v8  ;;  %532 = vmatprep.mubr.f32.mxu0 %v3510_v3 }
 0x1ff   :  { %3034 = vmatprep.subr.bf16.mxu0 %v3598_v9 }
 0x202   :  { %3036 = vmatpush1.bf16.msra.mxu0 %v3614_v14 }
 0x203   :  { %3038 = vmatprep.subr.bf16.mxu0 %v3623_v17 }
 0x206   :  { %3040 = vmatpush1.bf16.msra.mxu0 %v3643_v23 }
 0x207   :  { %3042 = vmatprep.subr.bf16.mxu0 %v3647_v24 }
 0x20a   :  { %3044 = vmatpush1.bf16.msra.mxu0 %v3658_v27 }
 0x20b   :  { %3062 = vmatprep.subr.bf16.mxu0 %v3585_v4 }
 0x2d0   :  { %v326_v60 = vpop.f32.mrb[4].mxu0 }
 0x2d1   :  { %v332_v61 = vrot.slane %v326_v60, 6  ;;  %v328_v62 = vpop.f32.mrb[5].mxu0 }
 0x2d2   :  { %v341_v5 = vadd.f32 %v3697_v43, %v328_v62 }
 0x2d3   :  { %v334_v63 = vadd.f32 %v332_v61, %v3690_v35 }
 0x2d4   :  { %v343_v6 = vrot.slane %v341_v5, 6 }
 0x2d5   :  { %v2719_v0 = vmul.f32 -1.442695, %v334_v63 }
 0x2d7   :  { %3420 = vpow2.f32 %v2719_v0 }
 0x2e1   :  { %v3421_v1 = vpop.eup %3420 }
 0x2e2   :  { %v338_v2 = vadd.f32 1.0, %v3421_v1 }
 0x2e4   :  { %3422 = vrcp.f32 %v338_v2 }
 0x2ee   :  { %v3423_v7 = vpop.eup %3422 }
 0x2ef   :  { %v345_v10 = vmul.f32 %v3423_v7, %v343_v6  ;;  %v348_v13 = vsub.f32 1.0, %v3423_v7  ;;  %v356_v19 = vmul.f32 %v3423_v7, %v354_v15 }
 0x2f1   :  { %v346_v11 = vadd.f32 %v345_v10, %v3705_v47 }
 0x2f3   :  { %3424 = vtanh.f32 %v346_v11 }
 0x2fd   :  { %v3425_v12 = vpop.eup %3424 }
 0x2fe   :  { %350 = vrot.lane.b32.xlu1 %v3425_v12, %s3511_s4 }
 0x370   :  { %v351_v16 = vpop.permute.xlu1 %350 }
 0x371   :  { %v353_v18 = vmul.f32 %v351_v16, %v348_v13 }
 0x373   :  { %v3740_v20 = vadd.f32 %v356_v19, %v353_v18 }
 0x375   :  { %v359_v21 = vrot.slane %v3740_v20, 2  ;;  %v3759_v48 = vrot.slane %v3740_v20, 6 }
 0x377   :  { %360 = vrot.lane.b32.xlu1 %v359_v21, %s3511_s4 }
 0x3e9   :  { %v361_v22 = vpop.permute.xlu1 %360 }
 0x3ea   :  { %2720 = vmatmul.mubr.msk.f32.vlgmr.msra.gmra.mrb[2].mxu1 %vm161_vm1, %v361_v22 }
 0x3eb   :  { %3048 = vmatpush1.bf16.msra.mxu1 %v3596_v8  ;;  %636 = vmatprep.mubr.f32.mxu1 %v3510_v3 }
 0x3ec   :  { %3050 = vmatprep.subr.bf16.mxu1 %v3598_v9 }
 0x3ef   :  { %3052 = vmatpush1.bf16.msra.mxu1 %v3614_v14 }
 0x3f0   :  { %3054 = vmatprep.subr.bf16.mxu1 %v3623_v17 }
 0x3f3   :  { %3056 = vmatpush1.bf16.msra.mxu1 %v3643_v23 }
 0x3f4   :  { %3058 = vmatprep.subr.bf16.mxu1 %v3647_v24 }
 0x3f7   :  { %3060 = vmatpush1.bf16.msra.mxu1 %v3658_v27 }
 0x3f8   :  { %3078 = vmatprep.subr.bf16.mxu1 %v3585_v4 }
 0x4bd   :  { %v430_v25 = vpop.f32.mrb[2].mxu1 }
 0x4be   :  { %v436_v26 = vrot.slane %v430_v25, 4  ;;  %v432_v28 = vpop.f32.mrb[3].mxu1 }
 0x4bf   :  { %v445_v37 = vadd.f32 %v3697_v43, %v432_v28 }
 0x4c0   :  { %v438_v30 = vadd.f32 %v436_v26, %v3690_v35 }
 0x4c1   :  { %v447_v38 = vrot.slane %v445_v37, 4 }
 0x4c2   :  { %v2721_v32 = vmul.f32 -1.442695, %v438_v30 }
 0x4c4   :  { %3426 = vpow2.f32 %v2721_v32 }
 0x4ce   :  { %v3427_v33 = vpop.eup %3426 }
 0x4cf   :  { %v442_v36 = vadd.f32 1.0, %v3427_v33 }
 0x4d1   :  { %3428 = vrcp.f32 %v442_v36  ;;  %v3808_v36 = vadd.f32 %v3720_v58, %v3701_v44 }
 0x4db   :  { %v3429_v39 = vpop.eup %3428 }
 0x4dc   :  { %v449_v40 = vmul.f32 %v3429_v39, %v447_v38  ;;  %v452_v46 = vsub.f32 1.0, %v3429_v39  ;;  %v460_v50 = vmul.f32 %v3429_v39, %v3759_v48 }
 0x4de   :  { %v450_v41 = vadd.f32 %v449_v40, %v3705_v47 }
 0x4e0   :  { %3430 = vtanh.f32 %v450_v41 }
 0x4ea   :  { %v3431_v45 = vpop.eup %3430 }
 0x4eb   :  { %454 = vrot.lane.b32.xlu0 %v3431_v45, %s3511_s4 }
 0x55d   :  { %v455_v49 = vpop.permute.xlu0 %454 }
 0x55e   :  { %v457_v51 = vmul.f32 %v455_v49, %v452_v46 }
 0x560   :  { %v3762_v52 = vadd.f32 %v460_v50, %v457_v51 }
 0x562   :  { %v463_v53 = vrot.slane %v3762_v52, 4  ;;  %v562_v12 = vrot.slane %v3762_v52, 6 }
 0x564   :  { %464 = vrot.lane.b32.xlu1 %v463_v53, %s3511_s4 }
 0x5d6   :  { %v465_v54 = vpop.permute.xlu1 %464 }
 0x5d7   :  { %2722 = vmatmul.mubr.msk.f32.vlgmr.msra.gmra.mrb[6].mxu0 %vm161_vm1, %v465_v54 }
 0x5d8   :  { %3064 = vmatpush1.bf16.msra.mxu0 %v3596_v8  ;;  %732 = vmatprep.mubr.f32.mxu0 %v3510_v3 }
 0x5d9   :  { %3066 = vmatprep.subr.bf16.mxu0 %v3598_v9 }
 0x5dc   :  { %3068 = vmatpush1.bf16.msra.mxu0 %v3614_v14 }
 0x5dd   :  { %3070 = vmatprep.subr.bf16.mxu0 %v3623_v17 }
 0x5e0   :  { %3072 = vmatpush1.bf16.msra.mxu0 %v3643_v23 }
 0x5e1   :  { %3074 = vmatprep.subr.bf16.mxu0 %v3647_v24 }
 0x5e4   :  { %3076 = vmatpush1.bf16.msra.mxu0 %v3658_v27 }
 0x5e5   :  { %3094 = vmatprep.subr.bf16.mxu0 %v3585_v4 }
 0x6aa   :  { %v534_v55 = vpop.f32.mrb[6].mxu0 }
 0x6ab   :  { %v540_v60 = vrot.slane %v534_v55, 2  ;;  %v536_v61 = vpop.f32.mrb[7].mxu0 }
 0x6ac   :  { %v549_v2 = vadd.f32 %v3697_v43, %v536_v61 }
 0x6ad   :  { %v542_v62 = vadd.f32 %v540_v60, %v3690_v35 }
 0x6ae   :  { %v551_v5 = vrot.slane %v549_v2, 2 }
 0x6af   :  { %v2723_v63 = vmul.f32 -1.442695, %v542_v62 }
 0x6b1   :  { %3432 = vpow2.f32 %v2723_v63 }
 0x6bb   :  { %v3433_v0 = vpop.eup %3432 }
 0x6bc   :  { %v546_v1 = vadd.f32 1.0, %v3433_v0 }
 0x6be   :  { %3434 = vrcp.f32 %v546_v1 }
 0x6c8   :  { %v3435_v6 = vpop.eup %3434 }
 0x6c9   :  { %v553_v7 = vmul.f32 %v3435_v6, %v551_v5  ;;  %v556_v4 = vsub.f32 1.0, %v3435_v6  ;;  %v564_v13 = vmul.f32 %v3435_v6, %v562_v12 }
 0x6cb   :  { %v554_v10 = vadd.f32 %v553_v7, %v3705_v47  ;;  %v3802_v47 = vadd.f32 %v3718_v57, %v3687_v34 }
 0x6cd   :  { %3436 = vtanh.f32 %v554_v10 }
 0x6d7   :  { %v3437_v11 = vpop.eup %3436 }
 0x6d8   :  { %558 = vrot.lane.b32.xlu0 %v3437_v11, %s3511_s4 }
 0x74a   :  { %v559_v35 = vpop.permute.xlu0 %558 }
 0x74b   :  { %v561_v15 = vmul.f32 %v559_v35, %v556_v4 }
 0x74d   :  { %v3781_v16 = vadd.f32 %v564_v13, %v561_v15 }
 0x74f   :  { %v3784_v18 = vrot.slane %v3781_v16, 6 }
 0x751   :  { %568 = vrot.lane.b32.xlu1 %v3784_v18, %s3511_s4 }
 0x7c3   :  { %v3788_v19 = vpop.permute.xlu1 %568 }
 0x7c4   :  { %2724 = vmatmul.mubr.msk.f32.vlgmr.msra.gmra.mrb[4].mxu1 %vm161_vm1, %v3788_v19 }
 0x7c5   :  { %3080 = vmatpush1.bf16.msra.mxu1 %v3596_v8  ;;  %836 = vmatprep.mubr.f32.mxu1 %v3510_v3 }
 0x7c6   :  { %3082 = vmatprep.subr.bf16.mxu1 %v3598_v9 }
 0x7c9   :  { %3084 = vmatpush1.bf16.msra.mxu1 %v3614_v14 }
 0x7ca   :  { %3086 = vmatprep.subr.bf16.mxu1 %v3623_v17 }
 0x7cd   :  { %3088 = vmatpush1.bf16.msra.mxu1 %v3643_v23 }
 0x7ce   :  { %3090 = vmatprep.subr.bf16.mxu1 %v3647_v24 }
 0x7d1   :  { %3092 = vmatpush1.bf16.msra.mxu1 %v3658_v27 }
 0x897   :  { %v638_v21 = vpop.f32.mrb[4].mxu1 }
 0x898   :  { %v643_v22 = vadd.f32 %v638_v21, %v3802_v47  ;;  %v640_v25 = vpop.f32.mrb[5].mxu1 }
 0x899   :  { %v650_v32 = vadd.f32 %v3697_v43, %v640_v25 }
 0x89a   :  { %v2725_v26 = vmul.f32 -1.442695, %v643_v22 }
 0x89c   :  { %3438 = vpow2.f32 %v2725_v26 }
 0x8a6   :  { %v3439_v28 = vpop.eup %3438 }
 0x8a7   :  { %v647_v30 = vadd.f32 1.0, %v3439_v28 }
 0x8a9   :  { %3440 = vrcp.f32 %v647_v30 }
 0x8b3   :  { %v3441_v33 = vpop.eup %3440 }
 0x8b4   :  { %v651_v37 = vmul.f32 %v3441_v33, %v650_v32  ;;  %v654_v38 = vsub.f32 1.0, %v3441_v33  ;;  %v661_v40 = vmul.f32 %v3441_v33, %v3784_v18 }
 0x8b6   :  { %v652_v34 = vadd.f32 %v651_v37, %v3808_v36 }
 0x8b8   :  { %3442 = vtanh.f32 %v652_v34 }
 0x8c2   :  { %v3443_v57 = vpop.eup %3442 }
 0x8c3   :  { %656 = vrot.lane.b32.xlu0 %v3443_v57, %s3511_s4 }
 0x935   :  { %v657_v39 = vpop.permute.xlu0 %656 }
 0x936   :  { %v659_v41 = vmul.f32 %v657_v39, %v654_v38 }
 0x938   :  { %v3813_v45 = vadd.f32 %v661_v40, %v659_v41 }
 0x93a   :  { %664 = vrot.lane.b32.xlu1 %v3813_v45, %s3511_s4  ;;  %v762_v55 = vrot.slane %v3813_v45, 6 }
 0x9ac   :  { %v3817_v46 = vpop.permute.xlu1 %664 }
 0x9ad   :  { %2726 = vmatmul.mubr.msk.f32.vlgmr.msra.gmra.mrb[8].mxu0 %vm161_vm1, %v3817_v46 }
 0x9ae   :  { %3096 = vmatpush1.bf16.msra.mxu0 %v3596_v8  ;;  %940 = vmatprep.mubr.f32.mxu0 %v3510_v3 }
 0x9af   :  { %3098 = vmatprep.subr.bf16.mxu0 %v3598_v9 }
 0x9b2   :  { %3100 = vmatpush1.bf16.msra.mxu0 %v3614_v14 }
 0x9b3   :  { %3102 = vmatprep.subr.bf16.mxu0 %v3623_v17 }
 0x9b6   :  { %3104 = vmatpush1.bf16.msra.mxu0 %v3643_v23 }
 0x9b7   :  { %3106 = vmatprep.subr.bf16.mxu0 %v3647_v24 }
 0x9ba   :  { %3108 = vmatpush1.bf16.msra.mxu0 %v3658_v27 }
 0xa80   :  { %v734_v44 = vpop.f32.mrb[8].mxu0 }
 0xa81   :  { %v740_v58 = vrot.slane %v734_v44, 6  ;;  %v736_v49 = vpop.f32.mrb[9].mxu0 }
 0xa82   :  { %v749_v9 = vadd.f32 %v3697_v43, %v736_v49 }
 0xa83   :  { %v742_v50 = vadd.f32 %v740_v58, %v3802_v47 }
 0xa84   :  { %v751_v14 = vrot.slane %v749_v9, 6 }
 0xa85   :  { %v2727_v8 = vmul.f32 -1.442695, %v742_v50 }
 0xa87   :  { %3444 = vpow2.f32 %v2727_v8 }
 0xa91   :  { %v3445_v51 = vpop.eup %3444 }
 0xa92   :  { %v746_v53 = vadd.f32 1.0, %v3445_v51 }
 0xa94   :  { %3446 = vrcp.f32 %v746_v53 }
 0xa9e   :  { %v3447_v17 = vpop.eup %3446 }
 0xa9f   :  { %v753_v54 = vmul.f32 %v3447_v17, %v751_v14  ;;  %v756_v27 = vsub.f32 1.0, %v3447_v17  ;;  %v764_v62 = vmul.f32 %v3447_v17, %v762_v55  ;;  %v1065_v17 = vld [vmem:[%s4560_s5 + $0x18] sm:$0xff] }
 0xaa1   :  { %v754_v23 = vadd.f32 %v753_v54, %v3808_v36 }
 0xaa3   :  { %3448 = vtanh.f32 %v754_v23  ;;  %v1064_v23 = vld [vmem:[%s4560_s5 + $0x10] sm:$0xff] }
 0xaad   :  { %v3449_v24 = vpop.eup %3448 }
 0xaae   :  { %758 = vrot.lane.b32.xlu0 %v3449_v24, %s3511_s4  ;;  %v1067_v24 = vld [vmem:[%s4560_s5 + $0x28] sm:$0xff] }
 0xb20   :  { %v759_v60 = vpop.permute.xlu0 %758 }
 0xb21   :  { %v761_v61 = vmul.f32 %v759_v60, %v756_v27  ;;  %v1069_v27 = vld [vmem:[%s4560_s5 + $0x38] sm:$0xff] }
 0xb22   :  { %v3113_v60 = vpack.c.bf16 %v1069_v27, %v1067_v24  ;;  %v1087_v27 = vld [vmem:[%s4560_s5 + $0xc8] sm:$0xff] }
 0xb23   :  { %v3834_v63 = vadd.f32 %v764_v62, %v761_v61  ;;  %v1066_v61 = vld [vmem:[%s4560_s5 + $0x20] sm:$0xff]  ;;  %v1068_v62 = vld [vmem:[%s4560_s5 + $0x30] sm:$0xff] }
 0xb25   :  { %v767_v0 = vrot.slane %v3834_v63, 2  ;;  %v3845_v26 = vrot.slane %v3834_v63, 6 }
 0xb27   :  { %768 = vrot.lane.b32.xlu1 %v767_v0, %s3511_s4  ;;  %v1071_v0 = vld [vmem:[%s4560_s5 + $0x48] sm:$0xff] }
 0xb99   :  { %v769_v1 = vpop.permute.xlu1 %768 }
 0xb9a   :  { %2728 = vmatmul.mubr.msk.f32.vlgmr.msra.gmra.mrb[6].mxu1 %vm161_vm1, %v769_v1  ;;  %v1009_v1 = vrot.slane %v3813_v45, 2 }
 0xb9b   :  { %1170 = vmatprep.mubr.f32.mxu1 %v3510_v3 }
 0xc6d   :  { %v838_v2 = vpop.f32.mrb[6].mxu1 }
 0xc6e   :  { %v844_v5 = vrot.slane %v838_v2, 4  ;;  %v840_v6 = vpop.f32.mrb[7].mxu1  ;;  %v1073_v2 = vld [vmem:[%s4560_s5 + $0x58] sm:$0xff] }
 0xc6f   :  { %v853_v12 = vadd.f32 %v3697_v43, %v840_v6  ;;  %v1025_v6 = vrot.slane %v3762_v52, 2 }
 0xc70   :  { %v846_v7 = vadd.f32 %v844_v5, %v3802_v47  ;;  %v3115_v5 = vpack.c.bf16 %v1068_v62, %v1066_v61  ;;  %v1086_v61 = vld [vmem:[%s4560_s5 + $0xc0] sm:$0xff]  ;;  %v1088_v62 = vld [vmem:[%s4560_s5 + $0xd0] sm:$0xff] }
 0xc71   :  { %v855_v35 = vrot.slane %v853_v12, 4  ;;  %v1077_v12 = vld [vmem:[%s4560_s5 + $0x78] sm:$0xff] }
 0xc72   :  { %v2729_v10 = vmul.f32 -1.442695, %v846_v7  ;;  %v3117_v7 = vpack.c.bf16 %v1073_v2, %v1071_v0  ;;  %v1192_v0 = vld [vmem:[%s4561_s7 + $0x48] sm:$0xff]  ;;  %v3135_v2 = vpack.c.bf16 %v1088_v62, %v1086_v61 }
 0xc74   :  { %3450 = vpow2.f32 %v2729_v10  ;;  %v1070_v10 = vld [vmem:[%s4560_s5 + $0x40] sm:$0xff] }
 0xc7e   :  { %v3451_v11 = vpop.eup %3450 }
 0xc7f   :  { %v850_v4 = vadd.f32 1.0, %v3451_v11  ;;  %v1072_v11 = vld [vmem:[%s4560_s5 + $0x50] sm:$0xff] }
 0xc81   :  { %3452 = vrcp.f32 %v850_v4  ;;  %v1075_v4 = vld [vmem:[%s4560_s5 + $0x68] sm:$0xff] }
 0xc8b   :  { %v3453_v13 = vpop.eup %3452 }
 0xc8c   :  { %v857_v15 = vmul.f32 %v3453_v13, %v855_v35  ;;  %v860_v25 = vsub.f32 1.0, %v3453_v13  ;;  %v868_v30 = vmul.f32 %v3453_v13, %v3845_v26  ;;  %v1184_v35 = vld [vmem:[%s4561_s7 + $0x8] sm:$0xff]  ;;  %v3399_v13 = vpack.i.bf16 %v1025_v6, %v3834_v63 }
 0xc8e   :  { %v858_v21 = vadd.f32 %v857_v15, %v3808_v36  ;;  %v1186_v15 = vld [vmem:[%s4561_s7 + $0x18] sm:$0xff] }
 0xc90   :  { %3454 = vtanh.f32 %v858_v21  ;;  %v1183_v21 = vld [vmem:[%s4561_s7] sm:$0xff] }
 0xc9a   :  { %v3455_v22 = vpop.eup %3454 }
 0xc9b   :  { %862 = vrot.lane.b32.xlu0 %v3455_v22, %s3511_s4  ;;  %v1185_v22 = vld [vmem:[%s4561_s7 + $0x10] sm:$0xff] }
 0xd0d   :  { %v863_v28 = vpop.permute.xlu0 %862 }
 0xd0e   :  { %v865_v32 = vmul.f32 %v863_v28, %v860_v25  ;;  %v3119_v25 = vpack.c.bf16 %v1072_v11, %v1070_v10  ;;  %v3928_v28 = vpack.c.bf16 %v1186_v15, %v1184_v35  ;;  %v1193_v10 = vld [vmem:[%s4561_s7 + $0x50] sm:$0xff]  ;;  %v1091_v15 = vld [vmem:[%s4560_s5 + $0xe8] sm:$0xff] }
 0xd10   :  { %v3848_v33 = vadd.f32 %v868_v30, %v865_v32  ;;  %v3930_v30 = vpack.c.bf16 %v1185_v22, %v1183_v21  ;;  %v3121_v32 = vpack.c.bf16 %v1077_v12, %v1075_v4  ;;  %3142 = vmatprep.subr.bf16.mxu0 %v3928_v28  ;;  %v1093_v21 = vld [vmem:[%s4560_s5 + $0xf8] sm:$0xff] }
 0xd12   :  { %v871_v37 = vrot.slane %v3848_v33, 4  ;;  %v989_v9 = vrot.slane %v3848_v33, 2  ;;  %v970_v4 = vrot.slane %v3848_v33, 6 }
 0xd14   :  { %872 = vrot.lane.b32.xlu1 %v871_v37, %s3511_s4  ;;  %v1074_v37 = vld [vmem:[%s4560_s5 + $0x60] sm:$0xff] }
 0xd86   :  { %v873_v34 = vpop.permute.xlu1 %872 }
 0xd87   :  { %2730 = vmatmul.mubr.msk.f32.vlgmr.msra.gmra.mrb[10].mxu0 %vm161_vm1, %v873_v34  ;;  %v1076_v34 = vld [vmem:[%s4560_s5 + $0x70] sm:$0xff] }
 0xd88   :  { %1277 = vmatprep.mubr.f32.mxu0 %v3510_v3  ;;  %3144 = vmatpush1.bf16.msra.mxu0 %v3930_v30 }
 0xe5a   :  { %v942_v57 = vpop.f32.mrb[10].mxu0 }
 0xe5b   :  { %v948_v38 = vrot.slane %v942_v57, 2  ;;  %v944_v39 = vpop.f32.mrb[11].mxu0  ;;  %v1079_v57 = vld [vmem:[%s4560_s5 + $0x88] sm:$0xff] }
 0xe5c   :  { %v957_v49 = vadd.f32 %v3697_v43, %v944_v39  ;;  %v1063_v43 = vld [vmem:[%s4560_s5 + $0x8] sm:$0xff]  ;;  %v3123_v39 = vpack.c.bf16 %v1076_v34, %v1074_v37  ;;  %v1090_v37 = vld [vmem:[%s4560_s5 + $0xe0] sm:$0xff]  ;;  %v1092_v34 = vld [vmem:[%s4560_s5 + $0xf0] sm:$0xff] }
 0xe5d   :  { %v950_v40 = vadd.f32 %v948_v38, %v3802_v47  ;;  %v3384_v47 = vpack.i.bf16 %v3762_v52, %v989_v9  ;;  %v3109_v54 = vpack.c.bf16 %v1065_v17, %v1063_v43  ;;  %v1081_v38 = vld [vmem:[%s4560_s5 + $0x98] sm:$0xff] }
 0xe5e   :  { %v959_v50 = vrot.slane %v957_v49, 2  ;;  %v1083_v49 = vld [vmem:[%s4560_s5 + $0xa8] sm:$0xff]  ;;  %v1190_v17 = vld [vmem:[%s4561_s7 + $0x38] sm:$0xff] }
 0xe5f   :  { %v2731_v41 = vmul.f32 -1.442695, %v950_v40  ;;  %3110 = vmatprep.subr.bf16.mxu1 %v3109_v54  ;;  %v3125_v40 = vpack.c.bf16 %v1081_v38, %v1079_v57  ;;  %v1189_v54 = vld [vmem:[%s4561_s7 + $0x30] sm:$0xff]  ;;  %v1196_v57 = vld [vmem:[%s4561_s7 + $0x68] sm:$0xff]  ;;  %v3139_v38 = vpack.c.bf16 %v1092_v34, %v1090_v37 }
 0xe61   :  { %3456 = vpow2.f32 %v2731_v41  ;;  %v1078_v41 = vld [vmem:[%s4560_s5 + $0x80] sm:$0xff] }
 0xe6b   :  { %v3457_v44 = vpop.eup %3456 }
 0xe6c   :  { %v954_v58 = vadd.f32 1.0, %v3457_v44  ;;  %v1080_v44 = vld [vmem:[%s4560_s5 + $0x90] sm:$0xff] }
 0xe6e   :  { %3458 = vrcp.f32 %v954_v58  ;;  %v3127_v58 = vpack.c.bf16 %v1080_v44, %v1078_v41  ;;  %v1045_v44 = vrot.slane %v3714_v56, 2 }
 0xe78   :  { %v3856_v8 = vpop.eup %3458 }
 0xe79   :  { %v961_v51 = vmul.f32 %v3856_v8, %v959_v50  ;;  %v1085_v50 = vld [vmem:[%s4560_s5 + $0xb8] sm:$0xff]  ;;  %v964_v11 = vsub.f32 1.0, %v3856_v8  ;;  %v972_v22 = vmul.f32 %v3856_v8, %v970_v4 }
 0xe7a   :  { %v1198_v8 = vld [vmem:[%s4561_s7 + $0x78] sm:$0xff] }
 0xe7b   :  { %v962_v53 = vadd.f32 %v961_v51, %v3808_v36  ;;  %v1062_v36 = vld [vmem:[%s4560_s5] sm:$0xff]  ;;  %v3129_v51 = vpack.c.bf16 %v1085_v50, %v1083_v49 }
 0xe7c   :  { %v3111_v55 = vpack.c.bf16 %v1064_v23, %v1062_v36  ;;  %v1187_v36 = vld [vmem:[%s4561_s7 + $0x20] sm:$0xff] }
 0xe7d   :  { %3460 = vtanh.f32 %v962_v53  ;;  %v1082_v53 = vld [vmem:[%s4560_s5 + $0xa0] sm:$0xff]  ;;  %v3979_v24 = vpack.c.bf16 %v1189_v54, %v1187_v36 }
 0xe7e   :  { %3112 = vmatpush1.bf16.msra.mxu1 %v3111_v55  ;;  %v1089_v55 = vld [vmem:[%s4560_s5 + $0xd8] sm:$0xff] }
 0xe7f   :  { %3114 = vmatprep.subr.bf16.mxu1 %v3113_v60  ;;  %v3133_v60 = vpack.c.bf16 %v1089_v55, %v1087_v27 }
 0xe82   :  { %3116 = vmatpush1.bf16.msra.mxu1 %v3115_v5  ;;  %v1194_v5 = vld [vmem:[%s4561_s7 + $0x58] sm:$0xff] }
 0xe83   :  { %3118 = vmatprep.subr.bf16.mxu1 %v3117_v7  ;;  %v1191_v7 = vld [vmem:[%s4561_s7 + $0x40] sm:$0xff]  ;;  %v4009_v12 = vpack.c.bf16 %v1194_v5, %v1192_v0 }
 0xe84   :  { %v4011_v35 = vpack.c.bf16 %v1193_v10, %v1191_v7 }
 0xe86   :  { %3120 = vmatpush1.bf16.msra.mxu1 %v3119_v25 }
 0xe87   :  { %v3461_v14 = vpop.eup %3460  ;;  %3122 = vmatprep.subr.bf16.mxu1 %v3121_v32  ;;  %v3137_v32 = vpack.c.bf16 %v1093_v21, %v1091_v15 }
 0xe88   :  { %966 = vrot.lane.b32.xlu0 %v3461_v14, %s3511_s4  ;;  %v1084_v14 = vld [vmem:[%s4560_s5 + $0xb0] sm:$0xff] }
 0xe89   :  { %v3131_v43 = vpack.c.bf16 %v1084_v14, %v1082_v53  ;;  %v3394_v14 = vpack.i.bf16 %v3781_v16, %v3845_v26 }
 0xe8a   :  { %3124 = vmatpush1.bf16.msra.mxu1 %v3123_v39  ;;  %v1195_v39 = vld [vmem:[%s4561_s7 + $0x60] sm:$0xff] }
 0xe8b   :  { %3126 = vmatprep.subr.bf16.mxu1 %v3125_v40  ;;  %v1197_v40 = vld [vmem:[%s4561_s7 + $0x70] sm:$0xff] }
 0xe8c   :  { %3385 = vrot.lane.b32.xlu0 %v3384_v47, %s3511_s4  ;;  %v1188_v47 = vld [vmem:[%s4561_s7 + $0x28] sm:$0xff]  ;;  %v4045_v49 = vpack.c.bf16 %v1197_v40, %v1195_v39 }
 0xe8d   :  { %v3977_v23 = vpack.c.bf16 %v1190_v17, %v1188_v47 }
 0xe8e   :  { %3128 = vmatpush1.bf16.msra.mxu1 %v3127_v58  ;;  %v4043_v58 = vpack.c.bf16 %v1198_v8, %v1196_v57 }
 0xe8f   :  { %3130 = vmatprep.subr.bf16.mxu1 %v3129_v51  ;;  %3146 = vmatprep.subr.bf16.mxu0 %v3977_v23 }
 0xe90   :  { %1010 = vrot.lane.b32.xlu0 %v1009_v1, %s3511_s4  ;;  %3148 = vmatpush1.bf16.msra.mxu0 %v3979_v24 }
 0xe91   :  { %3150 = vmatprep.subr.bf16.mxu0 %v4009_v12 }
 0xe92   :  { %3132 = vmatpush1.bf16.msra.mxu1 %v3131_v43 }
 0xe93   :  { %3134 = vmatprep.subr.bf16.mxu1 %v3133_v60 }
 0xe94   :  { %3400 = vrot.lane.b32.xlu0 %v3399_v13, %s3511_s4  ;;  %3152 = vmatpush1.bf16.msra.mxu0 %v4011_v35 }
 0xe95   :  { %3154 = vmatprep.subr.bf16.mxu0 %v4043_v58 }
 0xe96   :  { %3136 = vmatpush1.bf16.msra.mxu1 %v3135_v2 }
 0xe97   :  { %3138 = vmatprep.subr.bf16.mxu1 %v3137_v32 }
 0xe98   :  { %3156 = vmatpush1.bf16.msra.mxu0 %v4045_v49 }
 0xe9a   :  { %3140 = vmatpush1.bf16.msra.mxu1 %v3139_v38 }
 0xe9b   :  { %3170 = vmatprep.subr.bf16.mxu1 %v3928_v28  ;;  %1278 = vmatmul.mubr.f32.vlgmr.msra.gmra.mrb[12].mxu0 %v3510_v3 }
 0xe9c   :  { %2845 = vmatprep.mubr.msk.f32.mxu0 %vm3513_vm7, %v3510_v3 }
 0xefa   :  { %v967_v13 = vpop.permute.xlu0 %966 }
 0xefb   :  { %v969_v25 = vmul.f32 %v967_v13, %v964_v11 }
 0xefd   :  { %v4040_v41 = vadd.f32 %v972_v22, %v969_v25 }
 0xefe   :  { %v3386_v47 = vpop.permute.xlu0 %3385 }
 0xeff   :  { %v3409_v50 = vpack.i.bf16 %v1045_v44, %v4040_v41  ;;  %v976_v51 = vrot.slane %v4040_v41, 6  ;;  %v3387_v17 = vunpack.i.l.bf16 %v3386_v47  ;;  %v3388_v0 = vunpack.i.h.bf16 %v3386_v47 }
 0xf01   :  { %3410 = vrot.lane.b32.xlu0 %v3409_v50, %s3511_s4  ;;  %v3389_v53 = vpack.i.bf16 %v3740_v20, %v976_v51  ;;  %v4109_v50 = vld [vmem:[%s4563_s8] ss:$0 sm:$0xff] }
 0xf02   :  { %v1011_v7 = vpop.permute.xlu0 %1010 }
 0xf03   :  { %3390 = vrot.lane.b32.xlu1 %v3389_v53, %s3511_s4 }
 0xf06   :  { %v3401_v29 = vpop.permute.xlu0 %3400 }
 0xf07   :  { %3395 = vrot.lane.b32.xlu1 %v3394_v14, %s3511_s4 }
 0xf75   :  { %v3391_v43 = vpop.permute.xlu1 %3390 }
 0xf76   :  { %v3393_v36 = vunpack.i.h.bf16 %v3391_v43  ;;  %v3392_v54 = vunpack.i.l.bf16 %v3391_v43 }
 0xf78   :  { %v982_v27 = vsel %vm981_vm2, %v3722_v59, %v3392_v54  ;;  %v994_v55 = vsel %vm981_vm2, %v3393_v36, %v3387_v17  ;;  %v3404_v36 = vpack.i.bf16 %v3759_v48, %v3848_v33  ;;  %v3402_v54 = vunpack.i.l.bf16 %v3401_v29 }
 0xf79   :  { %v983_v60 = vsel %vm161_vm1, %v982_v27, %v976_v51  ;;  %v995_v61 = vsel %vm161_vm1, %v994_v55, %v989_v9  ;;  %v3396_v62 = vpop.permute.xlu1 %3395  ;;  %v3411_v27 = vpop.permute.xlu0 %3410 }
 0xf7a   :  { %v3398_v2 = vunpack.i.h.bf16 %v3396_v62  ;;  %v3397_v5 = vunpack.i.l.bf16 %v3396_v62  ;;  %v985_v10 = vsel %vm984_vm3, %v983_v60, %v3714_v56  ;;  %v996_v59 = vsel %vm984_vm3, %v995_v61, %v3740_v20 }
 0xf7b   :  { %v1054_v21 = vsel %vm1053_vm5, %v985_v10, %v996_v59  ;;  %v3413_v61 = vunpack.i.h.bf16 %v3411_v27  ;;  %v3412_v62 = vunpack.i.l.bf16 %v3411_v27 }
 0xf7c   :  { %v1003_v11 = vsel %vm981_vm2, %v3388_v0, %v3397_v5  ;;  %v1014_v4 = vsel %vm981_vm2, %v3398_v2, %v1011_v7  ;;  %v1019_v7 = vsel %vm981_vm2, %v3817_v46, %v3788_v19 }
 0xf7d   :  { %v1004_v9 = vsel %vm161_vm1, %v1003_v11, %v3845_v26  ;;  %v1015_v13 = vsel %vm161_vm1, %v1014_v4, %v1009_v1  ;;  %v1094_v1 = vld [vmem:[%s4562_s6] sm:$0x3]  ;;  %v1050_v11 = vsel %vm981_vm2, %v3412_v62, %v3413_v61 }
 0xf7e   :  { %v1005_v15 = vsel %vm984_vm3, %v1004_v9, %v3762_v52  ;;  %v1016_v20 = vsel %vm984_vm3, %v1015_v13, %v3781_v16  ;;  %v1279_v16 = vpop.f32.mrb[12].mxu0  ;;  %v4100_v32 = vrot.slane %v1094_v1, %v46_v31  ;;  %v4113_v31 = vrot.slane %v1094_v1, %v50_v42 }
 0xf7f   :  { %v1056_v22 = vsel %vm1055_vm4, %v1054_v21, %v1005_v15  ;;  %v1281_v26 = vpop.f32.mrb[13].mxu0  ;;  %v3403_v42 = vunpack.i.h.bf16 %v3401_v29  ;;  %v1020_v9 = vsel %vm161_vm1, %v1019_v7, %v3784_v18  ;;  %v1051_v46 = vsel %vm161_vm1, %v1050_v11, %v1045_v44 }
 0xf80   :  { %v1058_v25 = vsel %vm1057_vm6, %v1056_v22, %v1016_v20  ;;  %v1291_v51 = vadd.f32 %v4109_v50, %v1281_v26 }
 0xf81   :  { %1171 = vmatmul.mubr.f32.vlgmr.msra.gmra.mrb[8].mxu1 %v1058_v25  ;;  %v1030_v60 = vsel %vm981_vm2, %v3402_v54, %v3403_v42 }
 0xf82   :  { %1176 = vmatprep.mubr.f32.mxu1 %v3510_v3  ;;  %3172 = vmatpush1.bf16.msra.mxu1 %v3930_v30  ;;  %v1031_v10 = vsel %vm161_vm1, %v1030_v60, %v1025_v6  ;;  %v1021_v6 = vsel %vm984_vm3, %v1020_v9, %v3813_v45 }
 0xf83   :  { %3174 = vmatprep.subr.bf16.mxu1 %v3977_v23  ;;  %v1032_v19 = vsel %vm984_vm3, %v1031_v10, %v3834_v63  ;;  %v1052_v63 = vsel %vm984_vm3, %v1051_v46, %v4040_v41 }
 0xf84   :  { %v1059_v21 = vsel %vm1053_vm5, %v1021_v6, %v1032_v19 }
 0xf86   :  { %3176 = vmatpush1.bf16.msra.mxu1 %v3979_v24 }
 0xf87   :  { %3178 = vmatprep.subr.bf16.mxu1 %v4009_v12 }
 0xf8a   :  { %3180 = vmatpush1.bf16.msra.mxu1 %v4011_v35 }
 0xf8b   :  { %3182 = vmatprep.subr.bf16.mxu1 %v4043_v58 }
 0xf8e   :  { %3184 = vmatpush1.bf16.msra.mxu1 %v4045_v49 }
 0xf8f   :  { %3198 = vmatprep.subr.bf16.mxu1 %v3928_v28 }
0x1054   :  { %v1172_v37 = vpop.f32.mrb[8].mxu1 }
0x1055   :  { %v4103_v34 = vadd.f32 %v1172_v37, %v4100_v32  ;;  %v1174_v57 = vpop.f32.mrb[9].mxu1 }
0x1056   :  { %v4117_v14 = vadd.f32 %v1174_v57, %v4113_v31 }
0x1057   :  { %v1284_v38 = vadd.f32 %v1279_v16, %v4103_v34 }
0x1059   :  { %v2734_v8 = vmul.f32 -1.442695, %v1284_v38 }
0x105b   :  { %3462 = vpow2.f32 %v2734_v8 }
0x1065   :  { %v3463_v39 = vpop.eup %3462 }
0x1066   :  { %v1288_v40 = vadd.f32 1.0, %v3463_v39 }
0x1068   :  { %3464 = vrcp.f32 %v1288_v40 }
0x1072   :  { %v3465_v53 = vpop.eup %3464 }
0x1073   :  { %v1292_v47 = vmul.f32 %v3465_v53, %v1291_v51  ;;  %v1295_v55 = vsub.f32 1.0, %v3465_v53  ;;  %v1301_v2 = vmul.f32 0.0, %v3465_v53 }
0x1075   :  { %v1293_v43 = vadd.f32 %v1292_v47, %v4117_v14 }
0x1077   :  { %3466 = vtanh.f32 %v1293_v43 }
0x1081   :  { %v3467_v17 = vpop.eup %3466 }
0x1082   :  { %1297 = vrot.lane.b32.xlu1 %v3467_v17, %s3511_s4 }
0x1086   :  { %3405 = vrot.lane.b32.xlu1 %v3404_v36, %s3511_s4 }
0x10f4   :  { %v1298_v0 = vpop.permute.xlu1 %1297 }
0x10f5   :  { %v1300_v5 = vmul.f32 %v1298_v0, %v1295_v55 }
0x10f7   :  { %v4131_v59 = vadd.f32 %v1301_v2, %v1300_v5 }
0x10f8   :  { %v3406_v4 = vpop.permute.xlu1 %3405 }
0x10f9   :  { %v3408_v13 = vunpack.i.h.bf16 %v3406_v4  ;;  %v3407_v15 = vunpack.i.l.bf16 %v3406_v4  ;;  %1389 = vrot.lane.b32.xlu1 %v4131_v59, %s3511_s4  ;;  %v1487_v8 = vrot.slane %v4131_v59, 6 }
0x10fb   :  { %v1039_v52 = vsel %vm981_vm2, %v3407_v15, %v3408_v13 }
0x10fc   :  { %v1040_v18 = vsel %vm161_vm1, %v1039_v52, %v3759_v48 }
0x10fd   :  { %v1041_v20 = vsel %vm984_vm3, %v1040_v18, %v3848_v33 }
0x10fe   :  { %v1060_v22 = vsel %vm1055_vm4, %v1059_v21, %v1041_v20 }
0x10ff   :  { %v1061_v56 = vsel %vm1057_vm6, %v1060_v22, %v1052_v63 }
0x1100   :  { %1177 = vmatmul.mubr.f32.gmra.mrb[10].mxu1 %v1061_v56 }
0x1101   :  { %1457 = vmatprep.mubr.f32.mxu1 %v3510_v3 }
0x116b   :  { %v1390_v44 = vpop.permute.xlu1 %1389 }
0x116c   :  { %2736 = vmatmul.mubr.msk.f32.vlgmr.msra.gmra.mrb[12].mxu1 %vm161_vm1, %v1390_v44 }
0x116d   :  { %3200 = vmatpush1.bf16.msra.mxu1 %v3930_v30  ;;  %1647 = vmatprep.mubr.f32.mxu1 %v3510_v3 }
0x116e   :  { %3202 = vmatprep.subr.bf16.mxu1 %v3977_v23 }
0x1171   :  { %3204 = vmatpush1.bf16.msra.mxu1 %v3979_v24 }
0x1172   :  { %3206 = vmatprep.subr.bf16.mxu1 %v4009_v12 }
0x1175   :  { %3208 = vmatpush1.bf16.msra.mxu1 %v4011_v35 }
0x1176   :  { %3210 = vmatprep.subr.bf16.mxu1 %v4043_v58 }
0x1179   :  { %3212 = vmatpush1.bf16.msra.mxu1 %v4045_v49 }
0x117a   :  { %3226 = vmatprep.subr.bf16.mxu1 %v3928_v28 }
0x11d3   :  { %v4166_v48 = vpop.f32.mrb[10].mxu1 }
0x11d4   :  { %v4168_v45 = vpop.f32.mrb[11].mxu1 }
0x123f   :  { %v1459_v33 = vpop.f32.mrb[12].mxu1 }
0x1240   :  { %v1465_v41 = vrot.slane %v1459_v33, 6  ;;  %v1461_v25 = vpop.f32.mrb[13].mxu1 }
0x1241   :  { %v1474_v57 = vadd.f32 %v4109_v50, %v1461_v25 }
0x1242   :  { %v1467_v16 = vadd.f32 %v1465_v41, %v4103_v34 }
0x1243   :  { %v1476_v38 = vrot.slane %v1474_v57, 6 }
0x1244   :  { %v2737_v26 = vmul.f32 -1.442695, %v1467_v16 }
0x1246   :  { %3468 = vpow2.f32 %v2737_v26 }
0x1250   :  { %v3469_v1 = vpop.eup %3468 }
0x1251   :  { %v1471_v37 = vadd.f32 1.0, %v3469_v1 }
0x1253   :  { %3470 = vrcp.f32 %v1471_v37 }
0x125d   :  { %v3471_v39 = vpop.eup %3470 }
0x125e   :  { %v1478_v40 = vmul.f32 %v3471_v39, %v1476_v38  ;;  %v1489_v51 = vmul.f32 %v3471_v39, %v1487_v8  ;;  %v1481_v43 = vsub.f32 1.0, %v3471_v39 }
0x1260   :  { %v1479_v53 = vadd.f32 %v1478_v40, %v4117_v14 }
0x1262   :  { %3472 = vtanh.f32 %v1479_v53 }
0x126c   :  { %v3473_v47 = vpop.eup %3472 }
0x126d   :  { %1483 = vrot.lane.b32.xlu0 %v3473_v47, %s3511_s4 }
0x12df   :  { %v1484_v17 = vpop.permute.xlu0 %1483 }
0x12e0   :  { %v1486_v36 = vmul.f32 %v1484_v17, %v1481_v43 }
0x12e2   :  { %v4175_v29 = vadd.f32 %v1489_v51, %v1486_v36 }
0x12e4   :  { %v1578_v42 = vrot.slane %v4175_v29, 2  ;;  %v1677_v10 = vrot.slane %v4175_v29, 6 }
0x12e6   :  { %1579 = vrot.lane.b32.xlu1 %v1578_v42, %s3511_s4 }
0x1358   :  { %v1580_v54 = vpop.permute.xlu1 %1579 }
0x1359   :  { %2739 = vmatmul.mubr.msk.f32.vlgmr.msra.gmra.mrb[14].mxu1 %vm161_vm1, %v1580_v54 }
0x135a   :  { %3228 = vmatpush1.bf16.msra.mxu1 %v3930_v30  ;;  %1837 = vmatprep.mubr.f32.mxu1 %v3510_v3 }
0x135b   :  { %3230 = vmatprep.subr.bf16.mxu1 %v3977_v23 }
0x135e   :  { %3232 = vmatpush1.bf16.msra.mxu1 %v3979_v24 }
0x135f   :  { %3234 = vmatprep.subr.bf16.mxu1 %v4009_v12 }
0x1362   :  { %3236 = vmatpush1.bf16.msra.mxu1 %v4011_v35 }
0x1363   :  { %3238 = vmatprep.subr.bf16.mxu1 %v4043_v58 }
0x1366   :  { %3240 = vmatpush1.bf16.msra.mxu1 %v4045_v49 }
0x1367   :  { %3254 = vmatprep.subr.bf16.mxu1 %v3928_v28 }
0x142c   :  { %v1649_v27 = vpop.f32.mrb[14].mxu1 }
0x142d   :  { %v1655_v55 = vrot.slane %v1649_v27, 4  ;;  %v1651_v60 = vpop.f32.mrb[15].mxu1 }
0x142e   :  { %v1664_v5 = vadd.f32 %v4109_v50, %v1651_v60 }
0x142f   :  { %v1657_v61 = vadd.f32 %v1655_v55, %v4103_v34 }
0x1430   :  { %v1666_v7 = vrot.slane %v1664_v5, 4 }
0x1431   :  { %v2740_v62 = vmul.f32 -1.442695, %v1657_v61  ;;  %v4235_v61 = vadd.f32 %v4168_v45, %v4113_v31 }
0x1433   :  { %3474 = vpow2.f32 %v2740_v62 }
0x143d   :  { %v3475_v0 = vpop.eup %3474 }
0x143e   :  { %v1661_v2 = vadd.f32 1.0, %v3475_v0 }
0x1440   :  { %3476 = vrcp.f32 %v1661_v2 }
0x144a   :  { %v3477_v11 = vpop.eup %3476 }
0x144b   :  { %v1668_v4 = vmul.f32 %v3477_v11, %v1666_v7  ;;  %v1679_v9 = vmul.f32 %v3477_v11, %v1677_v10  ;;  %v1671_v19 = vsub.f32 1.0, %v3477_v11 }
0x144d   :  { %v1669_v13 = vadd.f32 %v1668_v4, %v4117_v14 }
0x144f   :  { %3478 = vtanh.f32 %v1669_v13 }
0x1459   :  { %v3479_v15 = vpop.eup %3478 }
0x145a   :  { %1673 = vrot.lane.b32.xlu0 %v3479_v15, %s3511_s4 }
0x14cc   :  { %v1674_v52 = vpop.permute.xlu0 %1673 }
0x14cd   :  { %v1676_v46 = vmul.f32 %v1674_v52, %v1671_v19 }
0x14cf   :  { %v4194_v6 = vadd.f32 %v1679_v9, %v1676_v46 }
0x14d1   :  { %v1768_v18 = vrot.slane %v4194_v6, 4  ;;  %v1867_v26 = vrot.slane %v4194_v6, 6 }
0x14d3   :  { %1769 = vrot.lane.b32.xlu1 %v1768_v18, %s3511_s4 }
0x1545   :  { %v1770_v20 = vpop.permute.xlu1 %1769 }
0x1546   :  { %2742 = vmatmul.mubr.msk.f32.vlgmr.msra.gmra.mrb[16].mxu1 %vm161_vm1, %v1770_v20 }
0x1547   :  { %3256 = vmatpush1.bf16.msra.mxu1 %v3930_v30  ;;  %2027 = vmatprep.mubr.f32.mxu1 %v3510_v3 }
0x1548   :  { %3258 = vmatprep.subr.bf16.mxu1 %v3977_v23 }
0x154b   :  { %3260 = vmatpush1.bf16.msra.mxu1 %v3979_v24 }
0x154c   :  { %3262 = vmatprep.subr.bf16.mxu1 %v4009_v12 }
0x154f   :  { %3264 = vmatpush1.bf16.msra.mxu1 %v4011_v35 }
0x1550   :  { %3266 = vmatprep.subr.bf16.mxu1 %v4043_v58 }
0x1553   :  { %3268 = vmatpush1.bf16.msra.mxu1 %v4045_v49 }
0x1554   :  { %3282 = vmatprep.subr.bf16.mxu1 %v3928_v28 }
0x1619   :  { %v1839_v21 = vpop.f32.mrb[16].mxu1 }
0x161a   :  { %v1845_v63 = vrot.slane %v1839_v21, 2  ;;  %v1841_v22 = vpop.f32.mrb[17].mxu1 }
0x161b   :  { %v1854_v25 = vadd.f32 %v4109_v50, %v1841_v22 }
0x161c   :  { %v1847_v56 = vadd.f32 %v1845_v63, %v4103_v34 }
0x161d   :  { %v1856_v16 = vrot.slane %v1854_v25, 2 }
0x161e   :  { %v2743_v44 = vmul.f32 -1.442695, %v1847_v56 }
0x1620   :  { %3480 = vpow2.f32 %v2743_v44 }
0x162a   :  { %v3481_v33 = vpop.eup %3480 }
0x162b   :  { %v1851_v41 = vadd.f32 1.0, %v3481_v33 }
0x162d   :  { %3482 = vrcp.f32 %v1851_v41 }
0x1637   :  { %v3483_v1 = vpop.eup %3482 }
0x1638   :  { %v1858_v37 = vmul.f32 %v3483_v1, %v1856_v16  ;;  %v1869_v57 = vmul.f32 %v3483_v1, %v1867_v26  ;;  %v1861_v34 = vsub.f32 1.0, %v3483_v1  ;;  %v3512_v26 = vmov 0.0|0.0   ;;  %v1308_v1 = vld [vmem:[%s4564_s9 + $0x28] sm:$0xff] }
0x1639   :  { %3157 = vmatprep.subr.bf16.mxu0 %v3512_v26 }
0x163a   :  { %v1859_v38 = vadd.f32 %v1858_v37, %v4117_v14  ;;  %v4229_v14 = vadd.f32 %v4166_v48, %v4100_v32 }
0x163c   :  { %3484 = vtanh.f32 %v1859_v38 }
0x1646   :  { %v3485_v8 = vpop.eup %3484 }
0x1647   :  { %1863 = vrot.lane.b32.xlu0 %v3485_v8, %s3511_s4 }
0x16b9   :  { %v1864_v39 = vpop.permute.xlu0 %1863 }
0x16ba   :  { %v1866_v40 = vmul.f32 %v1864_v39, %v1861_v34 }
0x16bc   :  { %v4213_v51 = vadd.f32 %v1869_v57, %v1866_v40 }
0x16be   :  { %v1958_v53 = vrot.slane %v4213_v51, 6 }
0x16c0   :  { %1959 = vrot.lane.b32.xlu1 %v1958_v53, %s3511_s4 }
0x1732   :  { %v1960_v47 = vpop.permute.xlu1 %1959 }
0x1733   :  { %2745 = vmatmul.mubr.msk.f32.vlgmr.msra.gmra.mrb[18].mxu1 %vm161_vm1, %v1960_v47 }
0x1734   :  { %3284 = vmatpush1.bf16.msra.mxu1 %v3930_v30  ;;  %2208 = vmatprep.mubr.f32.mxu1 %v3510_v3 }
0x1735   :  { %3286 = vmatprep.subr.bf16.mxu1 %v3977_v23 }
0x1738   :  { %3288 = vmatpush1.bf16.msra.mxu1 %v3979_v24 }
0x1739   :  { %3290 = vmatprep.subr.bf16.mxu1 %v4009_v12 }
0x173c   :  { %3292 = vmatpush1.bf16.msra.mxu1 %v4011_v35 }
0x173d   :  { %3294 = vmatprep.subr.bf16.mxu1 %v4043_v58 }
0x1740   :  { %3296 = vmatpush1.bf16.msra.mxu1 %v4045_v49 }
0x1741   :  { %3310 = vmatprep.subr.bf16.mxu1 %v3928_v28 }
0x1806   :  { %v2029_v43 = vpop.f32.mrb[18].mxu1 }
0x1807   :  { %v2034_v17 = vadd.f32 %v2029_v43, %v4229_v14  ;;  %v2031_v36 = vpop.f32.mrb[19].mxu1 }
0x1808   :  { %v2041_v55 = vadd.f32 %v4109_v50, %v2031_v36 }
0x1809   :  { %v2746_v42 = vmul.f32 -1.442695, %v2034_v17 }
0x180b   :  { %3486 = vpow2.f32 %v2746_v42 }
0x1815   :  { %v3487_v54 = vpop.eup %3486 }
0x1816   :  { %v2038_v27 = vadd.f32 1.0, %v3487_v54 }
0x1818   :  { %3488 = vrcp.f32 %v2038_v27  ;;  %v1309_v27 = vld [vmem:[%s4564_s9 + $0x30] sm:$0xff] }
0x1822   :  { %v3489_v60 = vpop.eup %3488 }
0x1823   :  { %v2042_v62 = vmul.f32 %v3489_v60, %v2041_v55  ;;  %v2045_v0 = vsub.f32 1.0, %v3489_v60  ;;  %v2052_v5 = vmul.f32 %v3489_v60, %v1958_v53  ;;  %v1310_v55 = vld [vmem:[%s4564_s9 + $0x38] sm:$0xff] }
0x1824   :  { %v3167_v60 = vpack.c.bf16 %v1310_v55, %v1309_v27 }
0x1825   :  { %v2043_v32 = vadd.f32 %v2042_v62, %v4235_v61 }
0x1827   :  { %3490 = vtanh.f32 %v2043_v32 }
0x1831   :  { %v3491_v48 = vpop.eup %3490 }
0x1832   :  { %2047 = vrot.lane.b32.xlu0 %v3491_v48, %s3511_s4  ;;  %v1311_v48 = vmax.f32 %v4131_v59, 0.0  ;;  %v1491_v59 = vld [vmem:[%s4564_s9 + $0x40] sm:$0xff] }
0x18a4   :  { %v2048_v2 = vpop.permute.xlu0 %2047 }
0x18a5   :  { %v2050_v7 = vmul.f32 %v2048_v2, %v2045_v0  ;;  %v1689_v0 = vmax.f32 %v4194_v6, 0.0  ;;  %v1492_v6 = vld [vmem:[%s4564_s9 + $0x48] sm:$0xff] }
0x18a7   :  { %v4239_v10 = vadd.f32 %v2052_v5, %v2050_v7  ;;  %v1691_v2 = vrot.slane %v1689_v0, 4  ;;  %v1879_v5 = vmax.f32 %v4213_v51, 0.0  ;;  %v2057_v0 = vld [vmem:[%s4564_s9 + $0x118] sm:$0xff] }
0x18a9   :  { %2140 = vrot.lane.b32.xlu1 %v4239_v10, %s3511_s4  ;;  %v2238_v18 = vrot.slane %v4239_v10, 6  ;;  %v1881_v7 = vrot.slane %v1879_v5, 6  ;;  %v2058_v5 = vld [vmem:[%s4564_s9 + $0x120] sm:$0xff] }
0x191b   :  { %v2141_v11 = vpop.permute.xlu1 %2140 }
0x191c   :  { %2748 = vmatmul.mubr.msk.f32.vlgmr.msra.gmra.mrb[20].mxu1 %vm161_vm1, %v2141_v11 }
0x191d   :  { %3312 = vmatpush1.bf16.msra.mxu1 %v3930_v30  ;;  %2398 = vmatprep.mubr.f32.mxu1 %v3510_v3 }
0x191e   :  { %3314 = vmatprep.subr.bf16.mxu1 %v3977_v23 }
0x1921   :  { %3316 = vmatpush1.bf16.msra.mxu1 %v3979_v24 }
0x1922   :  { %3318 = vmatprep.subr.bf16.mxu1 %v4009_v12 }
0x1925   :  { %3320 = vmatpush1.bf16.msra.mxu1 %v4011_v35 }
0x1926   :  { %3322 = vmatprep.subr.bf16.mxu1 %v4043_v58 }
0x1929   :  { %3324 = vmatpush1.bf16.msra.mxu1 %v4045_v49 }
0x192a   :  { %3338 = vmatprep.subr.bf16.mxu1 %v3928_v28 }
0x19ef   :  { %v2210_v31 = vpop.f32.mrb[20].mxu1 }
0x19f0   :  { %v2216_v45 = vrot.slane %v2210_v31, 6  ;;  %v2212_v4 = vpop.f32.mrb[21].mxu1 }
0x19f1   :  { %v2225_v52 = vadd.f32 %v4109_v50, %v2212_v4 }
0x19f2   :  { %v2218_v9 = vadd.f32 %v2216_v45, %v4229_v14 }
0x19f3   :  { %v2227_v46 = vrot.slane %v2225_v52, 6 }
0x19f4   :  { %v2749_v13 = vmul.f32 -1.442695, %v2218_v9  ;;  %v3186_v9 = vpack.c.bf16 %v1492_v6, %v1491_v59 }
0x19f6   :  { %3492 = vpow2.f32 %v2749_v13 }
0x1a00   :  { %v3493_v15 = vpop.eup %3492 }
0x1a01   :  { %v2222_v19 = vadd.f32 1.0, %v3493_v15  ;;  %v1493_v15 = vld [vmem:[%s4564_s9 + $0x50] sm:$0xff] }
0x1a03   :  { %3494 = vrcp.f32 %v2222_v19  ;;  %v1494_v19 = vld [vmem:[%s4564_s9 + $0x58] sm:$0xff] }
0x1a0d   :  { %v3495_v20 = vpop.eup %3494 }
0x1a0e   :  { %v2229_v21 = vmul.f32 %v3495_v20, %v2227_v46  ;;  %v2240_v63 = vmul.f32 %v3495_v20, %v2238_v18  ;;  %v2232_v56 = vsub.f32 1.0, %v3495_v20  ;;  %v1499_v18 = vmax.f32 %v4175_v29, 0.0 }
0x1a0f   :  { %v3189_v20 = vpack.c.bf16 %v1494_v19, %v1493_v15 }
0x1a10   :  { %v2230_v28 = vadd.f32 %v2229_v21, %v4235_v61  ;;  %v1495_v21 = vld [vmem:[%s4564_s9 + $0x60] sm:$0xff] }
0x1a12   :  { %3496 = vtanh.f32 %v2230_v28  ;;  %v1501_v28 = vrot.slane %v1499_v18, 2 }
0x1a1c   :  { %v3497_v22 = vpop.eup %3496 }
0x1a1d   :  { %2234 = vrot.lane.b32.xlu0 %v3497_v22, %s3511_s4  ;;  %v1497_v22 = vld [vmem:[%s4564_s9 + $0x70] sm:$0xff] }
0x1a8f   :  { %v2235_v44 = vpop.permute.xlu0 %2234 }
0x1a90   :  { %v2237_v33 = vmul.f32 %v2235_v44, %v2232_v56  ;;  %v1498_v56 = vld [vmem:[%s4564_s9 + $0x78] sm:$0xff] }
0x1a91   :  { %v3195_v44 = vpack.c.bf16 %v1498_v56, %v1497_v22 }
0x1a92   :  { %v4258_v41 = vadd.f32 %v2240_v63, %v2237_v33  ;;  %v1496_v63 = vld [vmem:[%s4564_s9 + $0x68] sm:$0xff]  ;;  %v1681_v33 = vld [vmem:[%s4564_s9 + $0x80] sm:$0xff] }
0x1a93   :  { %v3192_v29 = vpack.c.bf16 %v1496_v63, %v1495_v21  ;;  %v2060_v21 = vld [vmem:[%s4564_s9 + $0x130] sm:$0xff] }
0x1a94   :  { %v2329_v25 = vrot.slane %v4258_v41, 2  ;;  %v2428_v17 = vrot.slane %v4258_v41, 6  ;;  %v2250_v11 = vmax.f32 %v4258_v41, 0.0  ;;  %v1682_v41 = vld [vmem:[%s4564_s9 + $0x88] sm:$0xff] }
0x1a96   :  { %2330 = vrot.lane.b32.xlu1 %v2329_v25, %s3511_s4  ;;  %v2252_v31 = vrot.slane %v2250_v11, 2 }
0x1b08   :  { %v2331_v16 = vpop.permute.xlu1 %2330 }
0x1b09   :  { %2751 = vmatmul.mubr.msk.f32.vlgmr.msra.gmra.mrb[22].mxu1 %vm161_vm1, %v2331_v16  ;;  %v3214_v16 = vpack.c.bf16 %v1682_v41, %v1681_v33  ;;  %v2243_v33 = vld [vmem:[%s4564_s9 + $0x148] sm:$0xff] }
0x1b0a   :  { %3340 = vmatpush1.bf16.msra.mxu1 %v3930_v30  ;;  %2588 = vmatprep.mubr.f32.mxu1 %v3510_v3  ;;  %v1303_v30 = vld [vmem:[%s4564_s9] sm:$0xff] }
0x1b0b   :  { %3342 = vmatprep.subr.bf16.mxu1 %v3977_v23  ;;  %v1304_v23 = vld [vmem:[%s4564_s9 + $0x8] sm:$0xff] }
0x1b0e   :  { %3344 = vmatpush1.bf16.msra.mxu1 %v3979_v24  ;;  %v1305_v24 = vld [vmem:[%s4564_s9 + $0x10] sm:$0xff] }
0x1b0f   :  { %3346 = vmatprep.subr.bf16.mxu1 %v4009_v12  ;;  %v3158_v12 = vpack.c.bf16 %v1304_v23, %v1303_v30  ;;  %v1683_v30 = vld [vmem:[%s4564_s9 + $0x90] sm:$0xff]  ;;  %v1684_v23 = vld [vmem:[%s4564_s9 + $0x98] sm:$0xff] }
0x1b11   :  { %3159 = vmatpush3.bf16.msra.mxu0 %v3158_v12  ;;  %v3217_v12 = vpack.c.bf16 %v1684_v23, %v1683_v30  ;;  %v2245_v30 = vld [vmem:[%s4564_s9 + $0x158] sm:$0xff] }
0x1b12   :  { %3348 = vmatpush1.bf16.msra.mxu1 %v4011_v35  ;;  %v1306_v35 = vld [vmem:[%s4564_s9 + $0x18] sm:$0xff]  ;;  %3160 = vmatprep.subr.bf16.mxu0 %v3512_v26 }
0x1b13   :  { %3350 = vmatprep.subr.bf16.mxu1 %v4043_v58  ;;  %v3161_v58 = vpack.c.bf16 %v1306_v35, %v1305_v24  ;;  %v1685_v35 = vld [vmem:[%s4564_s9 + $0xa0] sm:$0xff] }
0x1b15   :  { %3162 = vmatpush3.bf16.msra.mxu0 %v3161_v58  ;;  %v1686_v58 = vld [vmem:[%s4564_s9 + $0xa8] sm:$0xff] }
0x1b16   :  { %3352 = vmatpush1.bf16.msra.mxu1 %v4045_v49  ;;  %v1307_v49 = vld [vmem:[%s4564_s9 + $0x20] sm:$0xff]  ;;  %3163 = vmatprep.subr.bf16.mxu0 %v3512_v26 }
0x1b17   :  { %v3164_v37 = vpack.c.bf16 %v1308_v1, %v1307_v49  ;;  %v3220_v49 = vpack.c.bf16 %v1686_v58, %v1685_v35  ;;  %v1687_v1 = vld [vmem:[%s4564_s9 + $0xb0] sm:$0xff]  ;;  %v2246_v58 = vld [vmem:[%s4564_s9 + $0x160] sm:$0xff] }
0x1b19   :  { %3165 = vmatpush3.bf16.msra.mxu0 %v3164_v37  ;;  %v1688_v37 = vld [vmem:[%s4564_s9 + $0xb8] sm:$0xff] }
0x1b1a   :  { %3166 = vmatprep.subr.bf16.mxu0 %v3512_v26 }
0x1b1d   :  { %3168 = vmatpush3.bf16.msra.mxu0 %v3167_v60  ;;  %v2054_v60 = vld [vmem:[%s4564_s9 + $0x100] sm:$0xff] }
0x1b1e   :  { %3185 = vmatprep.subr.bf16.mxu0 %v3512_v26 }
0x1bdc   :  { %v2400_v57 = vpop.f32.mrb[22].mxu1 }
0x1bdd   :  { %v2406_v38 = vrot.slane %v2400_v57, 4  ;;  %v2402_v8 = vpop.f32.mrb[23].mxu1  ;;  %v3223_v57 = vpack.c.bf16 %v1688_v37, %v1687_v1  ;;  %v2248_v37 = vld [vmem:[%s4564_s9 + $0x170] sm:$0xff] }
0x1bde   :  { %v2415_v47 = vadd.f32 %v4109_v50, %v2402_v8  ;;  %v1872_v8 = vld [vmem:[%s4564_s9 + $0xc8] sm:$0xff] }
0x1bdf   :  { %v2408_v34 = vadd.f32 %v2406_v38, %v4229_v14  ;;  %v1871_v38 = vld [vmem:[%s4564_s9 + $0xc0] sm:$0xff] }
0x1be0   :  { %v2417_v43 = vrot.slane %v2415_v47, 4 }
0x1be1   :  { %v2752_v39 = vmul.f32 -1.442695, %v2408_v34  ;;  %v3242_v34 = vpack.c.bf16 %v1872_v8, %v1871_v38  ;;  %v2432_v8 = vld [vmem:[%s4564_s9 + $0x180] sm:$0xff] }
0x1be3   :  { %3498 = vpow2.f32 %v2752_v39  ;;  %v1873_v39 = vld [vmem:[%s4564_s9 + $0xd0] sm:$0xff] }
0x1bed   :  { %v3499_v40 = vpop.eup %3498 }
0x1bee   :  { %v2412_v53 = vadd.f32 1.0, %v3499_v40  ;;  %v1874_v40 = vld [vmem:[%s4564_s9 + $0xd8] sm:$0xff] }
0x1bef   :  { %v3245_v47 = vpack.c.bf16 %v1874_v40, %v1873_v39  ;;  %v2434_v40 = vld [vmem:[%s4564_s9 + $0x190] sm:$0xff] }
0x1bf0   :  { %3500 = vrcp.f32 %v2412_v53 }
0x1bfa   :  { %v3501_v36 = vpop.eup %3500 }
0x1bfb   :  { %v2419_v42 = vmul.f32 %v3501_v36, %v2417_v43  ;;  %v2430_v54 = vmul.f32 %v3501_v36, %v2428_v17  ;;  %v2422_v45 = vsub.f32 1.0, %v3501_v36  ;;  %v1875_v43 = vld [vmem:[%s4564_s9 + $0xe0] sm:$0xff]  ;;  %v1876_v17 = vld [vmem:[%s4564_s9 + $0xe8] sm:$0xff] }
0x1bfc   :  { %v3248_v36 = vpack.c.bf16 %v1876_v17, %v1875_v43  ;;  %v2436_v17 = vld [vmem:[%s4564_s9 + $0x1a0] sm:$0xff] }
0x1bfd   :  { %v2420_v62 = vadd.f32 %v2419_v42, %v4235_v61  ;;  %v1877_v42 = vld [vmem:[%s4564_s9 + $0xf0] sm:$0xff] }
0x1bff   :  { %3502 = vtanh.f32 %v2420_v62  ;;  %v2055_v62 = vld [vmem:[%s4564_s9 + $0x108] sm:$0xff] }
0x1c09   :  { %v3503_v32 = vpop.eup %3502 }
0x1c0a   :  { %2424 = vrot.lane.b32.xlu0 %v3503_v32, %s3511_s4  ;;  %v2056_v32 = vld [vmem:[%s4564_s9 + $0x110] sm:$0xff] }
0x1c0e   :  { %1313 = vrot.lane.b32.xlu0 %v1311_v48, %s3511_s4  ;;  %v3270_v48 = vpack.c.bf16 %v2055_v62, %v2054_v60  ;;  %v2622_v60 = vld [vmem:[%s4564_s9 + $0x1c0] sm:$0xff]  ;;  %v2623_v62 = vld [vmem:[%s4564_s9 + $0x1c8] sm:$0xff] }
0x1c12   :  { %1692 = vrot.lane.b32.xlu0 %v1691_v2, %s3511_s4  ;;  %v3273_v2 = vpack.c.bf16 %v2057_v0, %v2056_v32  ;;  %v3354_v32 = vpack.c.bf16 %v2623_v62, %v2622_v60  ;;  %v2625_v0 = vld [vmem:[%s4564_s9 + $0x1d8] sm:$0xff] }
0x1c16   :  { %1882 = vrot.lane.b32.xlu0 %v1881_v7, %s3511_s4  ;;  %v2059_v7 = vld [vmem:[%s4564_s9 + $0x128] sm:$0xff] }
0x1c17   :  { %v3276_v11 = vpack.c.bf16 %v2059_v7, %v2058_v5  ;;  %v2626_v7 = vld [vmem:[%s4564_s9 + $0x1e0] sm:$0xff] }
0x1c1a   :  { %2253 = vrot.lane.b32.xlu0 %v2252_v31, %s3511_s4 }
0x1c7c   :  { %v2425_v51 = vpop.permute.xlu0 %2424 }
0x1c7d   :  { %v2427_v4 = vmul.f32 %v2425_v51, %v2422_v45 }
0x1c7f   :  { %v4321_v13 = vadd.f32 %v2430_v54, %v2427_v4  ;;  %v1878_v54 = vld [vmem:[%s4564_s9 + $0xf8] sm:$0xff] }
0x1c80   :  { %v1314_v52 = vpop.permute.xlu0 %1313  ;;  %v3251_v27 = vpack.c.bf16 %v1878_v54, %v1877_v42  ;;  %v2438_v54 = vld [vmem:[%s4564_s9 + $0x1b0] sm:$0xff] }
0x1c81   :  { %2846 = vmatmul.mubr.msk.f32.vlgmr.msra.gmra.mrb[14].mxu0 %vm161_vm1, %v1314_v52  ;;  %v2519_v46 = vrot.slane %v4321_v13, 4  ;;  %v2618_v52 = vrot.slane %v4321_v13, 6  ;;  %v2440_v22 = vmax.f32 %v4321_v13, 0.0  ;;  %v2244_v13 = vld [vmem:[%s4564_s9 + $0x150] sm:$0xff] }
0x1c82   :  { %3187 = vmatpush3.bf16.msra.mxu0 %v3186_v9  ;;  %2864 = vmatprep.mubr.msk.f32.mxu0 %vm3513_vm7, %v3510_v3 }
0x1c83   :  { %2520 = vrot.lane.b32.xlu1 %v2519_v46, %s3511_s4  ;;  %3188 = vmatprep.subr.bf16.mxu0 %v3512_v26  ;;  %v2442_v56 = vrot.slane %v2440_v22, 4 }
0x1c84   :  { %v1693_v53 = vpop.permute.xlu0 %1692 }
0x1c86   :  { %3190 = vmatpush3.bf16.msra.mxu0 %v3189_v20 }
0x1c87   :  { %1502 = vrot.lane.b32.xlu1 %v1501_v28, %s3511_s4  ;;  %3191 = vmatprep.subr.bf16.mxu0 %v3512_v26 }
0x1c88   :  { %v1883_v55 = vpop.permute.xlu0 %1882 }
0x1c8a   :  { %3193 = vmatpush3.bf16.msra.mxu0 %v3192_v29  ;;  %v2062_v29 = vmax.f32 %v4239_v10, 0.0 }
0x1c8b   :  { %3194 = vmatprep.subr.bf16.mxu0 %v3512_v26 }
0x1c8e   :  { %3196 = vmatpush3.bf16.msra.mxu0 %v3195_v44 }
0x1c8f   :  { %3213 = vmatprep.subr.bf16.mxu0 %v3512_v26 }
0x1cf5   :  { %v2521_v25 = vpop.permute.xlu1 %2520 }
0x1cf6   :  { %2754 = vmatmul.mubr.msk.f32.vlgmr.msra.gmra.mrb[24].mxu1 %vm161_vm1, %v2521_v25 }
0x1cf9   :  { %v1503_v24 = vpop.permute.xlu1 %1502 }
0x1cfa   :  { %2865 = vmatmul.mubr.msk.f32.vlgmr.msra.gmra.mrb[14].mxu0 %vm161_vm1, %v1503_v24 }
0x1cfb   :  { %3215 = vmatpush3.bf16.msra.mxu0 %v3214_v16  ;;  %2883 = vmatprep.mubr.msk.f32.mxu0 %vm3513_vm7, %v3510_v3 }
0x1cfc   :  { %3216 = vmatprep.subr.bf16.mxu0 %v3512_v26 }
0x1cff   :  { %3218 = vmatpush3.bf16.msra.mxu0 %v3217_v12  ;;  %v3301_v12 = vpack.c.bf16 %v2245_v30, %v2244_v13 }
0x1d00   :  { %3219 = vmatprep.subr.bf16.mxu0 %v3512_v26 }
0x1d03   :  { %3221 = vmatpush3.bf16.msra.mxu0 %v3220_v49  ;;  %v2247_v49 = vld [vmem:[%s4564_s9 + $0x168] sm:$0xff] }
0x1d04   :  { %3222 = vmatprep.subr.bf16.mxu0 %v3512_v26  ;;  %v3304_v1 = vpack.c.bf16 %v2247_v49, %v2246_v58 }
0x1d07   :  { %3224 = vmatpush3.bf16.msra.mxu0 %v3223_v57  ;;  %v2249_v57 = vld [vmem:[%s4564_s9 + $0x178] sm:$0xff] }
0x1d08   :  { %3241 = vmatprep.subr.bf16.mxu0 %v3512_v26  ;;  %v3307_v38 = vpack.c.bf16 %v2249_v57, %v2248_v37 }
0x1d0a   :  { %2884 = vmatmul.mubr.msk.f32.vlgmr.msra.gmra.mrb[14].mxu0 %vm161_vm1, %v1693_v53  ;;  %v2435_v53 = vld [vmem:[%s4564_s9 + $0x198] sm:$0xff] }
0x1d0b   :  { %3243 = vmatpush3.bf16.msra.mxu0 %v3242_v34  ;;  %2902 = vmatprep.mubr.msk.f32.mxu0 %vm3513_vm7, %v3510_v3  ;;  %v2433_v34 = vld [vmem:[%s4564_s9 + $0x188] sm:$0xff]  ;;  %v3329_v43 = vpack.c.bf16 %v2435_v53, %v2434_v40 }
0x1d0c   :  { %3244 = vmatprep.subr.bf16.mxu0 %v3512_v26  ;;  %v3326_v39 = vpack.c.bf16 %v2433_v34, %v2432_v8 }
0x1d0f   :  { %3246 = vmatpush3.bf16.msra.mxu0 %v3245_v47  ;;  %v2254_v47 = vpop.permute.xlu0 %2253 }
0x1d10   :  { %3247 = vmatprep.subr.bf16.mxu0 %v3512_v26 }
0x1d13   :  { %3249 = vmatpush3.bf16.msra.mxu0 %v3248_v36  ;;  %v2437_v36 = vld [vmem:[%s4564_s9 + $0x1a8] sm:$0xff] }
0x1d14   :  { %3250 = vmatprep.subr.bf16.mxu0 %v3512_v26  ;;  %v3332_v42 = vpack.c.bf16 %v2437_v36, %v2436_v17 }
0x1d17   :  { %3252 = vmatpush3.bf16.msra.mxu0 %v3251_v27  ;;  %v2439_v27 = vld [vmem:[%s4564_s9 + $0x1b8] sm:$0xff] }
0x1d18   :  { %3269 = vmatprep.subr.bf16.mxu0 %v3512_v26 }
0x1d1a   :  { %2903 = vmatmul.mubr.msk.f32.vlgmr.msra.gmra.mrb[14].mxu0 %vm161_vm1, %v1883_v55  ;;  %v3335_v55 = vpack.c.bf16 %v2439_v27, %v2438_v54 }
0x1d1b   :  { %2921 = vmatprep.mubr.msk.f32.mxu0 %vm3513_vm7, %v3510_v3  ;;  %3271 = vmatpush3.bf16.msra.mxu0 %v3270_v48  ;;  %v2624_v48 = vld [vmem:[%s4564_s9 + $0x1d0] sm:$0xff] }
0x1d1c   :  { %3272 = vmatprep.subr.bf16.mxu0 %v3512_v26  ;;  %v3357_v5 = vpack.c.bf16 %v2625_v0, %v2624_v48 }
0x1d1f   :  { %3274 = vmatpush3.bf16.msra.mxu0 %v3273_v2 }
0x1d20   :  { %3275 = vmatprep.subr.bf16.mxu0 %v3512_v26 }
0x1d23   :  { %3277 = vmatpush3.bf16.msra.mxu0 %v3276_v11  ;;  %v2627_v11 = vld [vmem:[%s4564_s9 + $0x1e8] sm:$0xff] }
0x1d24   :  { %3278 = vmatprep.subr.bf16.mxu0 %v3512_v26 }
0x1dc9   :  { %v2590_v31 = vpop.f32.mrb[24].mxu1 }
0x1dca   :  { %v2596_v45 = vrot.slane %v2590_v31, 2  ;;  %v2592_v59 = vpop.f32.mrb[25].mxu1  ;;  %v3360_v31 = vpack.c.bf16 %v2627_v11, %v2626_v7 }
0x1dcb   :  { %v2605_v15 = vadd.f32 %v4109_v50, %v2592_v59 }
0x1dcc   :  { %v2598_v6 = vadd.f32 %v2596_v45, %v4229_v14  ;;  %v2061_v14 = vld [vmem:[%s4564_s9 + $0x138] sm:$0xff]  ;;  %v2628_v45 = vld [vmem:[%s4564_s9 + $0x1f0] sm:$0xff] }
0x1dcd   :  { %v2607_v19 = vrot.slane %v2605_v15, 2  ;;  %v3279_v63 = vpack.c.bf16 %v2061_v14, %v2060_v21 }
0x1dce   :  { %v2755_v51 = vmul.f32 -1.442695, %v2598_v6 }
0x1dcf   :  { %3280 = vmatpush3.bf16.msra.mxu0 %v3279_v63 }
0x1dd0   :  { %3504 = vpow2.f32 %v2755_v51  ;;  %3297 = vmatprep.subr.bf16.mxu0 %v3512_v26  ;;  %v2733_v51 = vld [vmem:[%s4565_s10] ss:$0 sm:$0xff] }
0x1dda   :  { %v3505_v4 = vpop.eup %3504 }
0x1ddb   :  { %v2602_v9 = vadd.f32 1.0, %v3505_v4 }
0x1ddd   :  { %3506 = vrcp.f32 %v2602_v9 }
0x1de7   :  { %v3507_v46 = vpop.eup %3506 }
0x1de8   :  { %v2609_v18 = vmul.f32 %v3507_v46, %v2607_v19  ;;  %v2620_v20 = vmul.f32 %v3507_v46, %v2618_v52  ;;  %v2612_v44 = vsub.f32 1.0, %v3507_v46 }
0x1dea   :  { %v2610_v28 = vadd.f32 %v2609_v18, %v4235_v61  ;;  %v2242_v61 = vld [vmem:[%s4564_s9 + $0x140] sm:$0xff] }
0x1deb   :  { %v3298_v16 = vpack.c.bf16 %v2243_v33, %v2242_v61 }
0x1dec   :  { %3508 = vtanh.f32 %v2610_v28 }
0x1df6   :  { %v3509_v50 = vpop.eup %3508 }
0x1df7   :  { %2614 = vrot.lane.b32.xlu1 %v3509_v50, %s3511_s4 }
0x1dfb   :  { %2064 = vrot.lane.b32.xlu1 %v2062_v29, %s3511_s4 }
0x1dff   :  { %2443 = vrot.lane.b32.xlu1 %v2442_v56, %s3511_s4 }
0x1e69   :  { %v2615_v41 = vpop.permute.xlu1 %2614 }
0x1e6a   :  { %v2617_v25 = vmul.f32 %v2615_v41, %v2612_v44 }
0x1e6c   :  { %v2621_v10 = vadd.f32 %v2620_v20, %v2617_v25 }
0x1e6d   :  { %v2065_v23 = vpop.permute.xlu1 %2064 }
0x1e6e   :  { %v2630_v24 = vmax.f32 %v2621_v10, 0.0  ;;  %2922 = vmatmul.mubr.msk.f32.vlgmr.msra.gmra.mrb[14].mxu0 %vm161_vm1, %v2065_v23 }
0x1e6f   :  { %3299 = vmatpush3.bf16.msra.mxu0 %v3298_v16  ;;  %2940 = vmatprep.mubr.msk.f32.mxu0 %vm3513_vm7, %v3510_v3 }
0x1e70   :  { %v2632_v35 = vrot.slane %v2630_v24, 6  ;;  %3300 = vmatprep.subr.bf16.mxu0 %v3512_v26 }
0x1e71   :  { %v2444_v2 = vpop.permute.xlu1 %2443 }
0x1e72   :  { %2633 = vrot.lane.b32.xlu0 %v2632_v35, %s3511_s4 }
0x1e73   :  { %3302 = vmatpush3.bf16.msra.mxu0 %v3301_v12 }
0x1e74   :  { %3303 = vmatprep.subr.bf16.mxu0 %v3512_v26 }
0x1e77   :  { %3305 = vmatpush3.bf16.msra.mxu0 %v3304_v1 }
0x1e78   :  { %3306 = vmatprep.subr.bf16.mxu0 %v3512_v26 }
0x1e7b   :  { %3308 = vmatpush3.bf16.msra.mxu0 %v3307_v38 }
0x1e7c   :  { %3325 = vmatprep.subr.bf16.mxu0 %v3512_v26 }
0x1e7e   :  { %2941 = vmatmul.mubr.msk.f32.vlgmr.msra.gmra.mrb[14].mxu0 %vm161_vm1, %v2254_v47 }
0x1e7f   :  { %3327 = vmatpush3.bf16.msra.mxu0 %v3326_v39  ;;  %2959 = vmatprep.mubr.msk.f32.mxu0 %vm3513_vm7, %v3510_v3 }
0x1e80   :  { %3328 = vmatprep.subr.bf16.mxu0 %v3512_v26 }
0x1e83   :  { %3330 = vmatpush3.bf16.msra.mxu0 %v3329_v43 }
0x1e84   :  { %3331 = vmatprep.subr.bf16.mxu0 %v3512_v26 }
0x1e87   :  { %3333 = vmatpush3.bf16.msra.mxu0 %v3332_v42 }
0x1e88   :  { %3334 = vmatprep.subr.bf16.mxu0 %v3512_v26 }
0x1e8b   :  { %3336 = vmatpush3.bf16.msra.mxu0 %v3335_v55 }
0x1e8c   :  { %3353 = vmatprep.subr.bf16.mxu0 %v3512_v26 }
0x1e8e   :  { %2960 = vmatmul.mubr.msk.f32.vlgmr.msra.gmra.mrb[14].mxu0 %vm161_vm1, %v2444_v2 }
0x1e8f   :  { %3355 = vmatpush3.bf16.msra.mxu0 %v3354_v32  ;;  %2978 = vmatprep.mubr.msk.f32.mxu0 %vm3513_vm7, %v3510_v3  ;;  %v2629_v3 = vld [vmem:[%s4564_s9 + $0x1f8] sm:$0xff] }
0x1e90   :  { %3356 = vmatprep.subr.bf16.mxu0 %v3512_v26  ;;  %v3363_v59 = vpack.c.bf16 %v2629_v3, %v2628_v45 }
0x1e93   :  { %3358 = vmatpush3.bf16.msra.mxu0 %v3357_v5 }
0x1e94   :  { %3359 = vmatprep.subr.bf16.mxu0 %v3512_v26 }
0x1e97   :  { %3361 = vmatpush3.bf16.msra.mxu0 %v3360_v31 }
0x1e98   :  { %3362 = vmatprep.subr.bf16.mxu0 %v3512_v26 }
0x1e9b   :  { %3364 = vmatpush3.bf16.msra.mxu0 %v3363_v59 }
0x1ee4   :  { %v2634_v6 = vpop.permute.xlu0 %2633 }
0x1ee5   :  { %2979 = vmatmul.mubr.msk.f32.vlgmr.msra.gmra.mrb[14].mxu0 %vm161_vm1, %v2634_v6 }
0x1fb8   :  { %v2703_v4 = vpop.f32.mrb[14].mxu0 }
0x1fb9   :  { %v3365_v9 = vadd.f32 %v2733_v51, %v2703_v4  ;;  %v2980_v15 = vpop.f32.mrb[15].mxu0 }
0x1fbb   :  { %2709 = vst.msk [vmem:[%s4566_s11] sm:$0x3] %vm2708_vm8, %v3365_v9 }

</bundles_post_ra>
